<compile_context>
chip_gen: v7x
topology: tpu7x:2x2x1
jax: 0.10.0
libtpu: 0.0.40
codegen_flags: <defaults>
</compile_context>

<pallas_src>
import numpy as np
import jax
import jax.numpy as jnp
from jax.experimental import pallas as pl
from jax.experimental.pallas import tpu as pltpu


# ----------------------------- Pallas kernel ------------------------------

def _neet_kernel(x_ref, w1_ref, w2_ref, wf_ref, bf_ref, o_ref):
    """Whole Neet forward for a batch, fully VMEM-resident.

    x_ref : [B, 28, 28]   input (C==1 squeezed away)
    w1_ref: [144, 240]    conv1 band weight (bf16), col = j*10 + c, bias row 140
    w2_ref: [1152, 160]   conv2 band weight (bf16), col = j2*20 + co, bias row 1150
    wf_ref: [560, 5]      fused fc1@fc2@fc3 weight (bf16), remapped to the
                          kernel's pooled lane layout (zero rows on dead lanes)
    bf_ref: [1, 5]        fused FC bias (f32)
    o_ref : [B, 5]
    """
    B = x_ref.shape[0]
    f32 = jnp.float32
    bf16 = jnp.bfloat16

    x = x_ref[...]                                              # [B, 28, 28]

    # ---- conv1 (+bias, +ReLU) as ONE lane-dense MXU matmul ----------------
    # LHS rows = (b, output row i); K = concat over ky of the 28-wide input
    # row x[b, i+ky, :], plus a ones column that carries the bias.
    M1 = B * 24
    rows1 = [x[:, ky:ky + 24, :].reshape(M1, 28) for ky in range(5)]
    rows1.append(jnp.ones((M1, 4), f32))                        # bias col + pad
    xb1 = jnp.concatenate(rows1, axis=-1).astype(bf16)          # [M1, 144]
    y1 = jnp.dot(xb1, w1_ref[...], preferred_element_type=f32)  # [M1, 240]
    y1 = jnp.maximum(y1, 0.0)       # lanes = j*10 + c  (24 cols x 10 chans)

    # ---- maxpool1 2x2 (ReLU already applied; relu/pool commute) -----------
    z = y1.reshape(B, 12, 2, 240)                               # split rows only
    y1h = jnp.maximum(z[:, :, 0, :], z[:, :, 1, :])             # [B, 12, 240]
    # W-pool: max against the next 10-lane block; valid at lanes 20*jw + c.
    p1 = jnp.maximum(y1h[:, :, :230], y1h[:, :, 10:])           # [B, 12, 230]

    # ---- conv2 (+bias, +ReLU) as ONE lane-dense MXU matmul ----------------
    # Dropout2d is identity in eval mode.
    # LHS rows = (b, output row i); K = concat over ky of the 230-lane pooled
    # row (odd j-blocks are pool garbage and get zero weight), plus ones col.
    M2 = B * 8
    rows2 = [p1[:, ky:ky + 8, :].reshape(M2, 230) for ky in range(5)]
    rows2.append(jnp.ones((M2, 2), f32))                        # bias col + pad
    xb2 = jnp.concatenate(rows2, axis=-1).astype(bf16)          # [M2, 1152]
    y2 = jnp.dot(xb2, w2_ref[...], preferred_element_type=f32)  # [M2, 160]
    y2 = jnp.maximum(y2, 0.0)       # lanes = j2*20 + co (8 cols x 20 chans)

    # ---- maxpool2 2x2 ------------------------------------------------------
    z = y2.reshape(B, 4, 2, 160)
    y2h = jnp.maximum(z[:, :, 0, :], z[:, :, 1, :])             # [B, 4, 160]
    y2w = jnp.maximum(y2h[:, :, :140], y2h[:, :, 20:])          # [B, 4, 140]
    # Valid pooled values sit at lanes 40*j1 + co; the dead lanes hit zero
    # rows of wf below.  Flatten merges into the minor dim only.
    flat = y2w.reshape(B, 560).astype(bf16)

    # ---- fused fc1 ∘ fc2 ∘ fc3 (no activations in between) ----------------
    o_ref[...] = (jnp.dot(flat, wf_ref[...], preferred_element_type=f32)
                  + bf_ref[...])


_VMEM = pl.BlockSpec(memory_space=pltpu.MemorySpace.VMEM)


def neet_forward(x, prep_params):
    """x: [B, 1, 28, 28] float32 (PyTorch NCHW). Returns [B, 5] float32."""
    w1p, w2p, wfp, bfp = prep_params
    B = x.shape[0]
    x3 = x.reshape(B, 28, 28)          # C == 1 -> metadata-only squeeze
    return pl.pallas_call(
        _neet_kernel,
        out_shape=jax.ShapeDtypeStruct((B, 5), jnp.float32),
        in_specs=[_VMEM] * 5,
        out_specs=_VMEM,
    )(x3, w1p, w2p, wfp, bfp)


# ---------------------- one-time parameter preparation --------------------

def init_params(key):
    """Parameters in the native PyTorch layouts."""
    ks = jax.random.split(key, 10)
    s = 0.05
    w1c = s * jax.random.normal(ks[0], (10, 1, 5, 5), jnp.float32)
    b1c = s * jax.random.normal(ks[1], (10,), jnp.float32)
    w2c = s * jax.random.normal(ks[2], (20, 10, 5, 5), jnp.float32)
    b2c = s * jax.random.normal(ks[3], (20,), jnp.float32)
    fw1 = s * jax.random.normal(ks[4], (50, 320), jnp.float32)
    fb1 = s * jax.random.normal(ks[5], (50,), jnp.float32)
    fw2 = s * jax.random.normal(ks[6], (10, 50), jnp.float32)
    fb2 = s * jax.random.normal(ks[7], (10,), jnp.float32)
    fw3 = s * jax.random.normal(ks[8], (5, 10), jnp.float32)
    fb3 = s * jax.random.normal(ks[9], (5,), jnp.float32)
    return (w1c, b1c, w2c, b2c, fw1, fb1, fw2, fb2, fw3, fb3)


def prepare_params(torch_params):
    """One-time layout work: build the band im2row weights for both convs
    (biases folded via the ones column), collapse the FC chain, and remap the
    FC weight rows to the kernel's pooled lane layout."""
    (w1c, b1c, w2c, b2c, fw1, fb1, fw2, fb2, fw3, fb3) = [
        np.asarray(p, np.float32) for p in torch_params]

    # conv1 band weight [144, 240]:
    #   A[ky*28 + w, j*10 + c] = w1c[c,0,ky,w-j] for 0 <= w-j < 5, row 140 = bias.
    A = np.zeros((144, 240), np.float32)
    for ky in range(5):
        for j in range(24):
            for kx in range(5):
                A[ky * 28 + j + kx, j * 10:(j + 1) * 10] = w1c[:, 0, ky, kx]
    A[140, :] = np.tile(b1c, 24)

    # conv2 band weight [1152, 160]:
    #   W2[ky*230 + 20*(j2+kx) + ci, j2*20 + co] = w2c[co,ci,ky,kx], row 1150 = bias.
    #   (lanes 20*jw+10+ci of the pooled input are pool garbage -> zero rows)
    W2 = np.zeros((1152, 160), np.float32)
    for ky in range(5):
        for kx in range(5):
            for j2 in range(8):
                r0 = ky * 230 + 20 * (j2 + kx)
                W2[r0:r0 + 10, j2 * 20:(j2 + 1) * 20] = w2c[:, :, ky, kx].T
    W2[1150, :] = np.tile(b2c, 8)

    # FC chain collapse: out = flat @ (W1^T W2^T W3^T) + (b1 W2^T W3^T + b2 W3^T + b3)
    wf = fw1.T @ fw2.T @ fw3.T                     # [320,5], rows = torch (c,h,w)
    bf = fb1 @ fw2.T @ fw3.T + fb2 @ fw3.T + fb3   # [5]
    # Remap rows to the kernel's flattened layout flat[b, h*140 + 40*w + c];
    # all other (dead) lanes get zero rows.
    wfe = np.zeros((560, 5), np.float32)
    for c in range(20):
        for h in range(4):
            for w in range(4):
                wfe[h * 140 + 40 * w + c, :] = wf[c * 16 + h * 4 + w, :]

    return (jnp.asarray(A, jnp.bfloat16),
            jnp.asarray(W2, jnp.bfloat16),
            jnp.asarray(wfe, jnp.bfloat16),
            jnp.asarray(bf.reshape(1, 5), jnp.float32))


# --------------------------------- main ------------------------------------

if __name__ == "__main__":
    key = jax.random.PRNGKey(0)
    kx_, kp = jax.random.split(key)
    # 28x28 single-channel input is required so the flattened feature size is
    # 20*4*4 = 320 (hard-coded in the PyTorch module).
    x = jax.random.normal(kx_, (2, 1, 28, 28), jnp.float32)

    torch_params = init_params(kp)
    prep = prepare_params(torch_params)

    out = jax.jit(neet_forward)(x, prep)
    out = jax.block_until_ready(out)
    assert out.shape == (2, 5), out.shape
    print("KERNEL_OK")
</pallas_src>

<mosaic_0001>
module attributes {stable_mosaic.version = 11 : i64} {
  func.func @_neet_kernel(%arg0: memref<2x28x28xf32, #tpu.memory_space<vmem>>, %arg1: memref<144x240xbf16, #tpu.memory_space<vmem>>, %arg2: memref<1152x160xbf16, #tpu.memory_space<vmem>>, %arg3: memref<560x5xbf16, #tpu.memory_space<vmem>>, %arg4: memref<1x5xf32, #tpu.memory_space<vmem>>, %arg5: memref<2x5xf32, #tpu.memory_space<vmem>>) attributes {dimension_semantics = [], scalar_prefetch = 0 : i64, scratch_operands = 0 : i64, tpu.core_type = #tpu.core_type<tc>} {
    %c0 = arith.constant 0 : index
    %c0_0 = arith.constant 0 : index
    %c0_1 = arith.constant 0 : index
    %0 = vector.load %arg0[%c0, %c0_0, %c0_1] : memref<2x28x28xf32, #tpu.memory_space<vmem>>, vector<2x28x28xf32>
    %1 = vector.extract_strided_slice %0 {offsets = [0, 0, 0], sizes = [2, 24, 28], strides = [1, 1, 1]} : vector<2x28x28xf32> to vector<2x24x28xf32>
    %2 = vector.shape_cast %1 : vector<2x24x28xf32> to vector<48x28xf32>
    %3 = vector.extract_strided_slice %0 {offsets = [0, 1, 0], sizes = [2, 24, 28], strides = [1, 1, 1]} : vector<2x28x28xf32> to vector<2x24x28xf32>
    %4 = vector.shape_cast %3 : vector<2x24x28xf32> to vector<48x28xf32>
    %5 = vector.extract_strided_slice %0 {offsets = [0, 2, 0], sizes = [2, 24, 28], strides = [1, 1, 1]} : vector<2x28x28xf32> to vector<2x24x28xf32>
    %6 = vector.shape_cast %5 : vector<2x24x28xf32> to vector<48x28xf32>
    %7 = vector.extract_strided_slice %0 {offsets = [0, 3, 0], sizes = [2, 24, 28], strides = [1, 1, 1]} : vector<2x28x28xf32> to vector<2x24x28xf32>
    %8 = vector.shape_cast %7 : vector<2x24x28xf32> to vector<48x28xf32>
    %9 = vector.extract_strided_slice %0 {offsets = [0, 4, 0], sizes = [2, 24, 28], strides = [1, 1, 1]} : vector<2x28x28xf32> to vector<2x24x28xf32>
    %10 = vector.shape_cast %9 : vector<2x24x28xf32> to vector<48x28xf32>
    %cst = arith.constant 1.000000e+00 : f32
    %11 = vector.broadcast %cst : f32 to vector<48x4xf32>
    %12 = tpu.concatenate %2, %4, %6, %8, %10, %11 in 1 : vector<48x28xf32>, vector<48x28xf32>, vector<48x28xf32>, vector<48x28xf32>, vector<48x28xf32>, vector<48x4xf32> -> vector<48x144xf32>
    %13 = arith.truncf %12 : vector<48x144xf32> to vector<48x144xbf16>
    %c0_2 = arith.constant 0 : index
    %c0_3 = arith.constant 0 : index
    %14 = vector.load %arg1[%c0_2, %c0_3] : memref<144x240xbf16, #tpu.memory_space<vmem>>, vector<144x240xbf16>
    %cst_4 = arith.constant dense<0.000000e+00> : vector<48x240xf32>
    %15 = tpu.matmul %13, %14, %cst_4 {dimension_numbers = #tpu.dot_dimension_numbers<[1], [0], [0], [1], [0, 0, 1, 1], [], []>} : vector<48x144xbf16>, vector<144x240xbf16>, vector<48x240xf32> -> vector<48x240xf32>
    %cst_5 = arith.constant 0.000000e+00 : f32
    %16 = vector.broadcast %cst_5 : f32 to vector<48x240xf32>
    %17 = arith.maximumf %15, %16 : vector<48x240xf32>
    %18 = vector.shape_cast %17 : vector<48x240xf32> to vector<2x12x2x240xf32>
    %19 = vector.extract_strided_slice %18 {offsets = [0, 0, 0, 0], sizes = [2, 12, 1, 240], strides = [1, 1, 1, 1]} : vector<2x12x2x240xf32> to vector<2x12x1x240xf32>
    %20 = vector.shape_cast %19 : vector<2x12x1x240xf32> to vector<2x12x240xf32>
    %21 = vector.extract_strided_slice %18 {offsets = [0, 0, 1, 0], sizes = [2, 12, 1, 240], strides = [1, 1, 1, 1]} : vector<2x12x2x240xf32> to vector<2x12x1x240xf32>
    %22 = vector.shape_cast %21 : vector<2x12x1x240xf32> to vector<2x12x240xf32>
    %23 = arith.maximumf %20, %22 : vector<2x12x240xf32>
    %24 = vector.extract_strided_slice %23 {offsets = [0, 0, 0], sizes = [2, 12, 230], strides = [1, 1, 1]} : vector<2x12x240xf32> to vector<2x12x230xf32>
    %25 = vector.extract_strided_slice %23 {offsets = [0, 0, 10], sizes = [2, 12, 230], strides = [1, 1, 1]} : vector<2x12x240xf32> to vector<2x12x230xf32>
    %26 = arith.maximumf %24, %25 : vector<2x12x230xf32>
    %27 = vector.extract_strided_slice %26 {offsets = [0, 0, 0], sizes = [2, 8, 230], strides = [1, 1, 1]} : vector<2x12x230xf32> to vector<2x8x230xf32>
    %28 = vector.shape_cast %27 : vector<2x8x230xf32> to vector<16x230xf32>
    %29 = vector.extract_strided_slice %26 {offsets = [0, 1, 0], sizes = [2, 8, 230], strides = [1, 1, 1]} : vector<2x12x230xf32> to vector<2x8x230xf32>
    %30 = vector.shape_cast %29 : vector<2x8x230xf32> to vector<16x230xf32>
    %31 = vector.extract_strided_slice %26 {offsets = [0, 2, 0], sizes = [2, 8, 230], strides = [1, 1, 1]} : vector<2x12x230xf32> to vector<2x8x230xf32>
    %32 = vector.shape_cast %31 : vector<2x8x230xf32> to vector<16x230xf32>
    %33 = vector.extract_strided_slice %26 {offsets = [0, 3, 0], sizes = [2, 8, 230], strides = [1, 1, 1]} : vector<2x12x230xf32> to vector<2x8x230xf32>
    %34 = vector.shape_cast %33 : vector<2x8x230xf32> to vector<16x230xf32>
    %35 = vector.extract_strided_slice %26 {offsets = [0, 4, 0], sizes = [2, 8, 230], strides = [1, 1, 1]} : vector<2x12x230xf32> to vector<2x8x230xf32>
    %36 = vector.shape_cast %35 : vector<2x8x230xf32> to vector<16x230xf32>
    %cst_6 = arith.constant 1.000000e+00 : f32
    %37 = vector.broadcast %cst_6 : f32 to vector<16x2xf32>
    %38 = tpu.concatenate %28, %30, %32, %34, %36, %37 in 1 : vector<16x230xf32>, vector<16x230xf32>, vector<16x230xf32>, vector<16x230xf32>, vector<16x230xf32>, vector<16x2xf32> -> vector<16x1152xf32>
    %39 = arith.truncf %38 : vector<16x1152xf32> to vector<16x1152xbf16>
    %c0_7 = arith.constant 0 : index
    %c0_8 = arith.constant 0 : index
    %40 = vector.load %arg2[%c0_7, %c0_8] : memref<1152x160xbf16, #tpu.memory_space<vmem>>, vector<1152x160xbf16>
    %cst_9 = arith.constant dense<0.000000e+00> : vector<16x160xf32>
    %41 = tpu.matmul %39, %40, %cst_9 {dimension_numbers = #tpu.dot_dimension_numbers<[1], [0], [0], [1], [0, 0, 1, 1], [], []>} : vector<16x1152xbf16>, vector<1152x160xbf16>, vector<16x160xf32> -> vector<16x160xf32>
    %cst_10 = arith.constant 0.000000e+00 : f32
    %42 = vector.broadcast %cst_10 : f32 to vector<16x160xf32>
    %43 = arith.maximumf %41, %42 : vector<16x160xf32>
    %44 = vector.shape_cast %43 : vector<16x160xf32> to vector<2x4x2x160xf32>
    %45 = vector.extract_strided_slice %44 {offsets = [0, 0, 0, 0], sizes = [2, 4, 1, 160], strides = [1, 1, 1, 1]} : vector<2x4x2x160xf32> to vector<2x4x1x160xf32>
    %46 = vector.shape_cast %45 : vector<2x4x1x160xf32> to vector<2x4x160xf32>
    %47 = vector.extract_strided_slice %44 {offsets = [0, 0, 1, 0], sizes = [2, 4, 1, 160], strides = [1, 1, 1, 1]} : vector<2x4x2x160xf32> to vector<2x4x1x160xf32>
    %48 = vector.shape_cast %47 : vector<2x4x1x160xf32> to vector<2x4x160xf32>
    %49 = arith.maximumf %46, %48 : vector<2x4x160xf32>
    %50 = vector.extract_strided_slice %49 {offsets = [0, 0, 0], sizes = [2, 4, 140], strides = [1, 1, 1]} : vector<2x4x160xf32> to vector<2x4x140xf32>
    %51 = vector.extract_strided_slice %49 {offsets = [0, 0, 20], sizes = [2, 4, 140], strides = [1, 1, 1]} : vector<2x4x160xf32> to vector<2x4x140xf32>
    %52 = arith.maximumf %50, %51 : vector<2x4x140xf32>
    %53 = vector.shape_cast %52 : vector<2x4x140xf32> to vector<2x560xf32>
    %54 = arith.truncf %53 : vector<2x560xf32> to vector<2x560xbf16>
    %c0_11 = arith.constant 0 : index
    %c0_12 = arith.constant 0 : index
    %55 = vector.load %arg3[%c0_11, %c0_12] : memref<560x5xbf16, #tpu.memory_space<vmem>>, vector<560x5xbf16>
    %cst_13 = arith.constant dense<0.000000e+00> : vector<2x5xf32>
    %56 = tpu.matmul %54, %55, %cst_13 {dimension_numbers = #tpu.dot_dimension_numbers<[1], [0], [0], [1], [0, 0, 1, 1], [], []>} : vector<2x560xbf16>, vector<560x5xbf16>, vector<2x5xf32> -> vector<2x5xf32>
    %c0_14 = arith.constant 0 : index
    %c0_15 = arith.constant 0 : index
    %57 = vector.load %arg4[%c0_14, %c0_15] : memref<1x5xf32, #tpu.memory_space<vmem>>, vector<1x5xf32>
    %58 = vector.broadcast %57 : vector<1x5xf32> to vector<2x5xf32>
    %59 = arith.addf %56, %58 : vector<2x5xf32>
    %c0_16 = arith.constant 0 : index
    %c0_17 = arith.constant 0 : index
    %60 = vector.load %arg5[%c0_16, %c0_17] : memref<2x5xf32, #tpu.memory_space<vmem>>, vector<2x5xf32>
    tpu.vector_store %arg5[%c0_16, %c0_17], %59 {strides = array<i32>} : memref<2x5xf32, #tpu.memory_space<vmem>>, vector<2x5xf32>,
    return
  }
}

</mosaic_0001>

<bundles_post_ra>
// kernel: neet_forward.1
= control target key start
LH: loop header
LB: loop body
LE: loop exit
PB: predicated region body
PF: predicated region fallthrough
CT: control target
= control target key end

     0   :  { %vm38_vm0 = vcmask 1046528   ;;  %vm68_vm1 = vcmask 1044480   ;;  %vm53_vm2 = vcmask 1045504   ;;  %vm83_vm3 = vcmask 1043456   ;;  %s3832_s9 = smov 28   ;;  %s3833_s12 = smov 84   ;;  %s5408_s0 = inlined_call_operand.vmem [shape: f32[2,28,28], index: 0, kind: input, shape index: {}]   ;;  %s5409_s1 = inlined_call_operand.vmem [shape: bf16[144,240], index: 1, kind: input, shape index: {}]   ;;  %s5410_s2 = inlined_call_operand.vmem [shape: bf16[1152,160], index: 2, kind: input, shape index: {}]   ;;  %s5411_s3 = inlined_call_operand.vmem [shape: bf16[560,5], index: 3, kind: input, shape index: {}]   ;;  %s5412_s4 = inlined_call_operand.vmem [shape: f32[1,5], index: 4, kind: input, shape index: {}]   ;;  %s5413_s5 = inlined_call_operand.hbm [shape: f32[2,5], index: 5, kind: output, shape index: {}]  }
   0x1   :  { %v3883_v0 = vld [vmem:[%s5408_s0] sm:$0xff]  ;;  %v3888_v1 = vld [vmem:[%s5408_s0 + $0x8] sm:$0xff]  ;;  %v3893_v2 = vld [vmem:[%s5408_s0 + $0x10] sm:$0xff]  ;;  %s3834_s20 = smov 56   ;;  %s3835_s21 = smov 112  }
   0x2   :  { %v39_v3 = vrot.slane %v3883_v0, 1  ;;  %v40_v4 = vrot.slane %v3888_v1, 1  ;;  %v42_v5 = vrot.slane %v3893_v2, 1  ;;  %v69_v6 = vrot.slane %v3883_v0, 3  ;;  %v25_v14 = vld [vmem:[%s5408_s0 + $0x18] sm:$0xf] }
   0x3   :  { %v70_v7 = vrot.slane %v3888_v1, 3  ;;  %v72_v8 = vrot.slane %v3893_v2, 3  ;;  %v54_v9 = vrot.slane %v3883_v0, 2  ;;  %v55_v12 = vrot.slane %v3888_v1, 2  ;;  %v3912_v15 = vld [vmem:[%s5408_s0 + $0x20] sm:$0xff]  ;;  %v3919_v19 = vld [vmem:[%s5408_s0 + $0x28] sm:$0xff] }
   0x4   :  { %v41_v10 = vsel %vm38_vm0, %v39_v3, %v40_v4  ;;  %v43_v11 = vsel %vm38_vm0, %v40_v4, %v42_v5  ;;  %v57_v13 = vrot.slane %v3893_v2, 2  ;;  %v84_v23 = vrot.slane %v3883_v0, 4  ;;  %v3530_v24 = vld [vmem:[%s5409_s1 + $0x4] ss:$8 sps:$4 sm:$0xff]   ;;  %v3532_v25 = vld [vmem:[%s5409_s1] ss:$8 sps:$4 sm:$0xff]  }
   0x5   :  { %v3365_v16 = vpack.i.bf16 %v43_v11, %v41_v10  ;;  %v71_v17 = vsel %vm68_vm1, %v69_v6, %v70_v7  ;;  %v73_v18 = vsel %vm68_vm1, %v70_v7, %v72_v8  ;;  %v56_v21 = vsel %vm53_vm2, %v54_v9, %v55_v12  ;;  %v3533_v30 = vld [vmem:[%s5409_s1 + $0x14] ss:$8 sps:$4 sm:$0xff]   ;;  %v3948_v36 = vld [vmem:[%s5408_s0 + $0x38] sm:$0xf]  ;;  %329 = vmatprep.subr.bf16.mxu0 %v3530_v24  ;;  %v3536_v46 = vld [vmem:[%s5409_s1 + $0x24] ss:$8 sps:$4 sm:$0xff]  }
   0x6   :  { %v3375_v20 = vpack.i.bf16 %v73_v18, %v71_v17  ;;  %v58_v22 = vsel %vm53_vm2, %v55_v12, %v57_v13  ;;  %v85_v27 = vrot.slane %v3888_v1, 4  ;;  %v87_v28 = vrot.slane %v3893_v2, 4  ;;  %v3943_v35 = vld [vmem:[%s5408_s0 + $0x30] sm:$0xff]  ;;  %330 = vmatpush1.bf16.msra.mxu0 %v3532_v25  ;;  %v3538_v59 = vld [vmem:[%s5409_s1 + $0x20] ss:$8 sps:$4 sm:$0xff]  }
   0x7   :  { %3366 = vrot.lane.b32.xlu0 %v3365_v16, %s3832_s9  ;;  %v3370_v26 = vpack.i.bf16 %v58_v22, %v56_v21  ;;  %v44_v29 = vrot.slane %v25_v14, 1  ;;  %v46_v31 = vrot.slane %v3912_v15, 1  ;;  %v47_v32 = vrot.slane %v3919_v19, 1  ;;  %v3535_v41 = vld [vmem:[%s5409_s1 + $0x10] ss:$8 sps:$4 sm:$0xff]   ;;  %331 = vmatprep.subr.bf16.mxu0 %v3533_v30 }
   0x8   :  { %3376 = vrot.lane.b32.xlu1 %v3375_v20, %s3833_s12  ;;  %v59_v33 = vrot.slane %v25_v14, 2  ;;  %v61_v34 = vrot.slane %v3912_v15, 2  ;;  %v86_v37 = vsel %vm83_vm3, %v84_v23, %v85_v27  ;;  %v88_v38 = vsel %vm83_vm3, %v85_v27, %v87_v28  ;;  %v3539_v63 = vld [vmem:[%s5409_s1 + $0x34] ss:$8 sps:$4 sm:$0xff]   ;;  %v3542_v16 = vld [vmem:[%s5409_s1 + $0x44] ss:$8 sps:$4 sm:$0xff]  }
   0x9   :  { %v45_v39 = vsel %vm38_vm0, %v42_v5, %v44_v29  ;;  %v62_v40 = vrot.slane %v3919_v19, 2  ;;  %v3380_v42 = vpack.i.bf16 %v88_v38, %v86_v37  ;;  %v48_v43 = vsel %vm38_vm0, %v46_v31, %v47_v32  ;;  %v3544_v18 = vld [vmem:[%s5409_s1 + $0x40] ss:$8 sps:$4 sm:$0xff]   ;;  %v3545_v23 = vld [vmem:[%s5409_s1 + $0x54] ss:$8 sps:$4 sm:$0xff]  }
   0xa   :  { %v60_v44 = vsel %vm53_vm2, %v57_v13, %v59_v33  ;;  %v74_v45 = vrot.slane %v25_v14, 3  ;;  %v3385_v47 = vpack.i.bf16 %v48_v43, %v45_v39  ;;  %v76_v49 = vrot.slane %v3912_v15, 3  ;;  %332 = vmatpush1.bf16.msra.mxu0 %v3535_v41  ;;  %v3541_v13 = vld [vmem:[%s5409_s1 + $0x30] ss:$8 sps:$4 sm:$0xff]   ;;  %v3548_v29 = vld [vmem:[%s5409_s1 + $0x64] ss:$8 sps:$4 sm:$0xff]  }
   0xb   :  { %3371 = vrot.lane.b32.xlu0 %v3370_v26, %s3834_s20  ;;  %v63_v48 = vsel %vm53_vm2, %v61_v34, %v62_v40  ;;  %v77_v50 = vrot.slane %v3919_v19, 3  ;;  %v89_v53 = vrot.slane %v25_v14, 4  ;;  %v91_v54 = vrot.slane %v3912_v15, 4  ;;  %333 = vmatprep.subr.bf16.mxu0 %v3536_v46  ;;  %v3547_v27 = vld [vmem:[%s5409_s1 + $0x50] ss:$8 sps:$4 sm:$0xff]  }
   0xc   :  { %3381 = vrot.lane.b32.xlu1 %v3380_v42, %s3835_s21  ;;  %v3390_v51 = vpack.i.bf16 %v63_v48, %v60_v44  ;;  %v75_v52 = vsel %vm68_vm1, %v72_v8, %v74_v45  ;;  %v92_v56 = vrot.slane %v3919_v19, 4  ;;  %v49_v57 = vrot.slane %v3943_v35, 1  ;;  %v3550_v30 = vld [vmem:[%s5409_s1 + $0x60] ss:$8 sps:$4 sm:$0xff]   ;;  %v3551_v31 = vld [vmem:[%s5409_s1 + $0x74] ss:$8 sps:$4 sm:$0xff]  }
   0xd   :  { %v78_v55 = vsel %vm68_vm1, %v76_v49, %v77_v50  ;;  %v51_v58 = vrot.slane %v3948_v36, 1  ;;  %v90_v60 = vsel %vm83_vm3, %v87_v28, %v89_v53  ;;  %v64_v61 = vrot.slane %v3943_v35, 2  ;;  %v3554_v33 = vld [vmem:[%s5409_s1 + $0x84] ss:$8 sps:$4 sm:$0xff]   ;;  %v3556_v34 = vld [vmem:[%s5409_s1 + $0x80] ss:$8 sps:$4 sm:$0xff]  }
   0xe   :  { %v66_v62 = vrot.slane %v3948_v36, 2  ;;  %v3395_v3 = vpack.i.bf16 %v78_v55, %v75_v52  ;;  %v93_v4 = vsel %vm83_vm3, %v91_v54, %v92_v56  ;;  %v50_v6 = vsel %vm38_vm0, %v47_v32, %v49_v57  ;;  %334 = vmatpush1.bf16.msra.mxu0 %v3538_v59  ;;  %v3553_v32 = vld [vmem:[%s5409_s1 + $0x70] ss:$8 sps:$4 sm:$0xff]  }
   0xf   :  { %3386 = vrot.lane.b32.xlu0 %v3385_v47, %s3832_s9  ;;  %v3400_v5 = vpack.i.bf16 %v93_v4, %v90_v60  ;;  %v52_v7 = vsel %vm38_vm0, %v49_v57, %v51_v58  ;;  %v79_v8 = vrot.slane %v3943_v35, 3  ;;  %v65_v9 = vsel %vm53_vm2, %v62_v40, %v64_v61  ;;  %335 = vmatprep.subr.bf16.mxu0 %v3539_v63 }
  0x10   :  { %3391 = vrot.lane.b32.xlu1 %v3390_v51, %s3834_s20  ;;  %v67_v10 = vsel %vm53_vm2, %v64_v61, %v66_v62  ;;  %v81_v11 = vrot.slane %v3948_v36, 3  ;;  %v94_v12 = vrot.slane %v3943_v35, 4  ;;  %v96_v14 = vrot.slane %v3948_v36, 4 }
  0x11   :  { %v3405_v17 = vpack.i.bf16 %v52_v7, %v50_v6  ;;  %v3410_v20 = vpack.i.bf16 %v67_v10, %v65_v9  ;;  %v80_v21 = vsel %vm68_vm1, %v77_v50, %v79_v8 }
  0x12   :  { %v82_v22 = vsel %vm68_vm1, %v79_v8, %v81_v11  ;;  %v95_v24 = vsel %vm83_vm3, %v92_v56, %v94_v12  ;;  %v97_v25 = vsel %vm83_vm3, %v94_v12, %v96_v14  ;;  %336 = vmatpush1.bf16.msra.mxu0 %v3541_v13 }
  0x13   :  { %3396 = vrot.lane.b32.xlu0 %v3395_v3, %s3833_s12  ;;  %337 = vmatprep.subr.bf16.mxu0 %v3542_v16  ;;  %v3415_v26 = vpack.i.bf16 %v82_v22, %v80_v21  ;;  %v3420_v28 = vpack.i.bf16 %v97_v25, %v95_v24 }
  0x14   :  { %3401 = vrot.lane.b32.xlu1 %v3400_v5, %s3835_s21 }
  0x16   :  { %338 = vmatpush1.bf16.msra.mxu0 %v3544_v18 }
  0x17   :  { %3406 = vrot.lane.b32.xlu0 %v3405_v17, %s3832_s9  ;;  %339 = vmatprep.subr.bf16.mxu0 %v3545_v23 }
  0x18   :  { %3411 = vrot.lane.b32.xlu1 %v3410_v20, %s3834_s20 }
  0x1a   :  { %340 = vmatpush1.bf16.msra.mxu0 %v3547_v27 }
  0x1b   :  { %3416 = vrot.lane.b32.xlu0 %v3415_v26, %s3833_s12  ;;  %341 = vmatprep.subr.bf16.mxu0 %v3548_v29 }
  0x1c   :  { %3421 = vrot.lane.b32.xlu1 %v3420_v28, %s3835_s21 }
  0x1e   :  { %342 = vmatpush1.bf16.msra.mxu0 %v3550_v30 }
  0x1f   :  { %343 = vmatprep.subr.bf16.mxu0 %v3551_v31 }
  0x22   :  { %344 = vmatpush1.bf16.msra.mxu0 %v3553_v32 }
  0x23   :  { %345 = vmatprep.subr.bf16.mxu0 %v3554_v33 }
  0x26   :  { %346 = vmatpush1.bf16.msra.mxu0 %v3556_v34 }
  0x27   :  { %10 = vsyncpa [#allocation3], 0  ;;  %vm170_vm4 = vcmask 228352   ;;  %vm177_vm5 = vcmask 457728   ;;  %vm198_vm6 = vcmask 97280   ;;  %vm184_vm7 = vcmask 687104  }
  0x28   :  { %vm191_vm8 = vcmask 916480   ;;  %vm319_vm9 = vcmask 130048   ;;  %s3837_s1 = smov 118   ;;  %vm740_vm10 = vcmask 965632   ;;  %vm957_vm11 = vcmask 1041409   ;;  %s3838_s21 = smov 102  }
  0x29   :  { %vm959_vm12 = vcmask 1042434   ;;  %vm961_vm13 = vcmask 1043459   ;;  %vm963_vm14 = vcmask 1044484   ;;  %vm965_vm15 = vcmask 1045509   ;;  %s3839_s27 = smov 76   ;;  %s3840_s30 = smov 50  }
  0x2a   :  { %vm967_vm0 = vcmask 1046534   ;;  %vm969_vm1 = vcmask 1047559   ;;  %vm1113_vm2 = vcmask 621568   ;;  %vm1050_vm3 = vcmask 834560   ;;  %s3841_s14 = smov 24   ;;  %s3846_s11 = smov 12  }
  0x2b   :  { %s3848_s9 = smov 36  }
  0x79   :  { %v3367_v36 = vpop.permute.xlu0 %3366 }
  0x7a   :  { %v3377_v37 = vpop.permute.xlu1 %3376  ;;  %v3369_v38 = vunpack.i.h.bf16 %v3367_v36  ;;  %v3368_v39 = vunpack.i.l.bf16 %v3367_v36 }
  0x7b   :  { %v3379_v41 = vunpack.i.h.bf16 %v3377_v37  ;;  %v3378_v42 = vunpack.i.l.bf16 %v3377_v37 }
  0x7c   :  { %v172_v46 = vsel %vm170_vm4, %v3888_v1, %v3369_v38  ;;  %v171_v47 = vsel %vm170_vm4, %v3883_v0, %v3368_v39 }
  0x7d   :  { %v3372_v40 = vpop.permute.xlu0 %3371 }
  0x7e   :  { %v3374_v43 = vunpack.i.h.bf16 %v3372_v40  ;;  %v3373_v44 = vunpack.i.l.bf16 %v3372_v40  ;;  %v3382_v45 = vpop.permute.xlu1 %3381 }
  0x7f   :  { %v3384_v48 = vunpack.i.h.bf16 %v3382_v45  ;;  %v3383_v49 = vunpack.i.l.bf16 %v3382_v45 }
  0x80   :  { %v178_v50 = vsel %vm177_vm5, %v171_v47, %v3373_v44  ;;  %v179_v51 = vsel %vm177_vm5, %v172_v46, %v3374_v43  ;;  %v3836_v44 = vmov 1983009808   ;;  %v421_v46 = vlaneseq }
  0x81   :  { %v3387_v52 = vpop.permute.xlu0 %3386  ;;  %v199_v53 = vsel %vm198_vm6, %v3383_v49, 1.0  ;;  %v200_v54 = vsel %vm198_vm6, %v3384_v48, 1.0  ;;  %v185_v55 = vsel %vm184_vm7, %v178_v50, %v3378_v42  ;;  %v186_v56 = vsel %vm184_vm7, %v179_v51, %v3379_v41 }
  0x82   :  { %v3389_v1 = vunpack.i.h.bf16 %v3387_v52  ;;  %v3388_v57 = vunpack.i.l.bf16 %v3387_v52  ;;  %v3392_v58 = vpop.permute.xlu1 %3391  ;;  %v206_v0 = vpack.c.bf16 %v200_v54, %v199_v53  ;;  %v192_v59 = vsel %vm191_vm8, %v185_v55, %v3383_v49 }
  0x83   :  { %v3394_v60 = vunpack.i.h.bf16 %v3392_v58  ;;  %v3393_v61 = vunpack.i.l.bf16 %v3392_v58  ;;  %v193_v62 = vsel %vm191_vm8, %v186_v56, %v3384_v48  ;;  %v419_v45 = vunpack.c.l.s4 %v3836_v44 }
  0x84   :  { %v174_v63 = vsel %vm170_vm4, %v3912_v15, %v3389_v1  ;;  %v173_v3 = vsel %vm170_vm4, %v3893_v2, %v3388_v57  ;;  %3057 = vmatprep.mubr.msk.bf16.mxu0 %vm319_vm9, %v206_v0  ;;  %v205_v4 = vpack.c.bf16 %v193_v62, %v192_v59  ;;  %v4075_v48 = vshrl.u32 %v421_v46, 7 }
  0x85   :  { %v3397_v5 = vpop.permute.xlu0 %3396  ;;  %v180_v9 = vsel %vm177_vm5, %v173_v3, %v3393_v61  ;;  %v181_v10 = vsel %vm177_vm5, %v174_v63, %v3394_v60  ;;  %v420_v47 = vunpack.c.0.s8 %v419_v45 }
  0x86   :  { %v3399_v6 = vunpack.i.h.bf16 %v3397_v5  ;;  %v3398_v7 = vunpack.i.l.bf16 %v3397_v5  ;;  %362 = vmatmul.mubr.bf16.vlgmr.msra.gmra.mrb[0].mxu0 %v205_v4  ;;  %v3402_v8 = vpop.permute.xlu1 %3401  ;;  %5421 = vst [vmem:[#allocation5_spill] sm:$0xff] %v4075_v48 }
  0x87   :  { %v3404_v11 = vunpack.i.h.bf16 %v3402_v8  ;;  %v3403_v12 = vunpack.i.l.bf16 %v3402_v8  ;;  %v4078_v53 = vsub.s32 %v420_v47, %v4075_v48 }
  0x88   :  { %v187_v13 = vsel %vm184_vm7, %v180_v9, %v3398_v7  ;;  %v188_v15 = vsel %vm184_vm7, %v181_v10, %v3399_v6 }
  0x89   :  { %v202_v2 = vsel %vm198_vm6, %v3404_v11, 1.0  ;;  %v201_v14 = vsel %vm198_vm6, %v3403_v12, 1.0  ;;  %v3407_v16 = vpop.permute.xlu0 %3406  ;;  %v194_v17 = vsel %vm191_vm8, %v187_v13, %v3403_v12  ;;  %v195_v18 = vsel %vm191_vm8, %v188_v15, %v3404_v11  ;;  %5422 = vst [vmem:[#allocation6_spill] sm:$0xff] %v4078_v53 }
  0x8a   :  { %v208_v20 = vpack.c.bf16 %v202_v2, %v201_v14  ;;  %v3409_v21 = vunpack.i.h.bf16 %v3407_v16  ;;  %v3408_v22 = vunpack.i.l.bf16 %v3407_v16  ;;  %v3412_v23 = vpop.permute.xlu1 %3411  ;;  %v207_v24 = vpack.c.bf16 %v195_v18, %v194_v17 }
  0x8b   :  { %v3414_v25 = vunpack.i.h.bf16 %v3412_v23  ;;  %v3413_v26 = vunpack.i.l.bf16 %v3412_v23 }
  0x8c   :  { %v176_v27 = vsel %vm170_vm4, %v3943_v35, %v3409_v21  ;;  %v175_v28 = vsel %vm170_vm4, %v3919_v19, %v3408_v22  ;;  %3058 = vmatprep.mubr.msk.bf16.mxu0 %vm319_vm9, %v208_v20  ;;  %vm1176_vm4 = vcmask 408576  }
  0x8d   :  { %v3417_v29 = vpop.permute.xlu0 %3416  ;;  %v182_v33 = vsel %vm177_vm5, %v175_v28, %v3413_v26  ;;  %v183_v34 = vsel %vm177_vm5, %v176_v27, %v3414_v25  ;;  %vm1239_vm5 = vcmask 195584  }
  0x8e   :  { %v3419_v30 = vunpack.i.h.bf16 %v3417_v29  ;;  %v3418_v31 = vunpack.i.l.bf16 %v3417_v29  ;;  %372 = vmatmul.mubr.bf16.gmra.mrb[4].mxu0 %v207_v24  ;;  %v3422_v32 = vpop.permute.xlu1 %3421 }
  0x8f   :  { %v3424_v36 = vunpack.i.h.bf16 %v3422_v32  ;;  %v3423_v37 = vunpack.i.l.bf16 %v3422_v32 }
  0x90   :  { %v189_v38 = vsel %vm184_vm7, %v182_v33, %v3418_v31  ;;  %v190_v35 = vsel %vm184_vm7, %v183_v34, %v3419_v30  ;;  %vm1254_vm7 = vcmask 1031168  }
  0x91   :  { %v204_v39 = vsel %vm198_vm6, %v3424_v36, 1.0  ;;  %v203_v19 = vsel %vm198_vm6, %v3423_v37, 1.0  ;;  %v196_v40 = vsel %vm191_vm8, %v189_v38, %v3423_v37  ;;  %v197_v41 = vsel %vm191_vm8, %v190_v35, %v3424_v36 }
  0x92   :  { %v210_v42 = vpack.c.bf16 %v204_v39, %v203_v19  ;;  %v209_v43 = vpack.c.bf16 %v197_v41, %v196_v40  ;;  %vm2461_vm8 = vcmask 883712  }
  0x94   :  { %3059 = vmatprep.mubr.msk.bf16.mxu0 %vm319_vm9, %v210_v42  ;;  %vm3847_vm9 = vmmov 0  }
  0x96   :  { %382 = vmatmul.mubr.bf16.gmra.mrb[8].mxu0 %v209_v43 }
 0x159   :  { %v363_v49 = vpop.f32.mrb[0].mxu0 }
 0x15a   :  { %v392_v50 = vmax.f32 %v363_v49, 0.0  ;;  %v365_v51 = vpop.f32.mrb[1].mxu0 }
 0x15b   :  { %v393_v52 = vmax.f32 %v365_v51, 0.0  ;;  %v367_v54 = vpop.f32.mrb[2].mxu0 }
 0x15c   :  { %v394_v55 = vmax.f32 %v367_v54, 0.0  ;;  %v369_v56 = vpop.f32.mrb[3].mxu0 }
 0x15d   :  { %v416_v1 = vcombine.low %v392_v50, %v393_v52  ;;  %v417_v57 = vcombine.high %v392_v50, %v393_v52  ;;  %v395_v58 = vmax.f32 %v369_v56, 0.0 }
 0x15f   :  { %v4081_v0 = vrot.slane %v416_v1, %v4078_v53  ;;  %v431_v59 = vrot.slane %v417_v57, %v4078_v53  ;;  %v434_v60 = vcombine.low %v394_v55, %v395_v58  ;;  %v435_v61 = vcombine.high %v394_v55, %v395_v58 }
 0x161   :  { %v373_v62 = vpop.f32.mrb[4].mxu0  ;;  %v432_v63 = vcombine.high %v4081_v0, %v4081_v0  ;;  %v3062_v5 = vrot.slane %v431_v59, 9  ;;  %v442_v2 = vrot.slane %v434_v60, %v4078_v53  ;;  %v433_v16 = vcombine.high %v431_v59, %v431_v59 }
 0x162   :  { %v396_v3 = vmax.f32 %v373_v62, 0.0  ;;  %v375_v4 = vpop.f32.mrb[5].mxu0  ;;  %v449_v32 = vrot.slane %v435_v61, %v4078_v53 }
 0x163   :  { %v397_v6 = vmax.f32 %v375_v4, 0.0  ;;  %v377_v7 = vpop.f32.mrb[6].mxu0  ;;  %v3061_v8 = vrot.slane %v432_v63, 9  ;;  %v4091_v14 = vmax.f32 %v431_v59, %v3062_v5  ;;  %v3063_v26 = vrot.slane %v433_v16, 9 }
 0x164   :  { %v398_v9 = vmax.f32 %v377_v7, 0.0  ;;  %v379_v10 = vpop.f32.mrb[7].mxu0  ;;  %v450_v27 = vcombine.high %v442_v2, %v442_v2  ;;  %v3064_v41 = vrot.slane %v442_v2, 9  ;;  %v451_v56 = vcombine.high %v449_v32, %v449_v32 }
 0x165   :  { %v452_v11 = vcombine.low %v396_v3, %v397_v6  ;;  %v4086_v12 = vcombine.high %v396_v3, %v397_v6  ;;  %v399_v13 = vmax.f32 %v379_v10, 0.0  ;;  %v4088_v15 = vmax.f32 %v432_v63, %v3061_v8 }
 0x166   :  { %v4103_v40 = vmax.f32 %v433_v16, %v3063_v26  ;;  %v3065_v42 = vrot.slane %v450_v27, 9  ;;  %v4119_v60 = vmax.f32 %v442_v2, %v3064_v41  ;;  %v3066_v4 = vrot.slane %v449_v32, 9  ;;  %v3563_v41 = vld [vmem:[%s5410_s2 + $0x124] ss:$8 sps:$4 sm:$0xff]  }
 0x167   :  { %v470_v17 = vcombine.low %v398_v9, %v399_v13  ;;  %v471_v18 = vcombine.high %v398_v9, %v399_v13  ;;  %v3425_v20 = vpack.i.bf16 %v4091_v14, %v4088_v15  ;;  %v460_v47 = vrot.slane %v452_v11, %v4078_v53 }
 0x168   :  { %v4125_v3 = vmax.f32 %v450_v27, %v3065_v42  ;;  %v3067_v8 = vrot.slane %v451_v56, 9  ;;  %v3575_v42 = vld [vmem:[%s5410_s2] ss:$8 sps:$4 sm:$0xff]  }
 0x169   :  { %v4096_v21 = vrot.slane %v470_v17, %v4078_v53  ;;  %v485_v22 = vrot.slane %v471_v18, %v4078_v53  ;;  %v383_v23 = vpop.f32.mrb[8].mxu0  ;;  %3426 = vrot.lane.b32.xlu0 %v3425_v20, %s3837_s1  ;;  %v468_v9 = vcombine.high %v460_v47, %v460_v47  ;;  %v4142_v18 = vrot.slane %v4086_v12, %v4078_v53 }
 0x16a   :  { %v400_v24 = vmax.f32 %v383_v23, 0.0  ;;  %v385_v25 = vpop.f32.mrb[9].mxu0  ;;  %v4145_v20 = vmax.f32 %v449_v32, %v3066_v4  ;;  %v4148_v23 = vmax.f32 %v451_v56, %v3067_v8  ;;  %v3569_v56 = vld [vmem:[%s5410_s2 + $0x144] ss:$8 sps:$4 sm:$0xff]   ;;  %v3599_v4 = vld [vmem:[%s5410_s2 + $0x40] ss:$8 sps:$4 sm:$0xff]  }
 0x16b   :  { %v401_v28 = vmax.f32 %v385_v25, 0.0  ;;  %v387_v29 = vpop.f32.mrb[10].mxu0  ;;  %v487_v30 = vcombine.high %v485_v22, %v485_v22  ;;  %v486_v31 = vcombine.high %v4096_v21, %v4096_v21  ;;  %v3074_v36 = vrot.slane %v485_v22, 9  ;;  %v3580_v8 = vld [vmem:[%s5410_s2 + $0x160] ss:$8 sps:$4 sm:$0xff]  }
 0x16c   :  { %v402_v33 = vmax.f32 %v387_v29, 0.0  ;;  %v389_v34 = vpop.f32.mrb[11].mxu0 }
 0x16d   :  { %v488_v37 = vcombine.low %v400_v24, %v401_v28  ;;  %v489_v38 = vcombine.high %v400_v24, %v401_v28  ;;  %v403_v35 = vmax.f32 %v389_v34, 0.0  ;;  %v3075_v39 = vrot.slane %v487_v30, 9 }
 0x16e   :  { %v3073_v19 = vrot.slane %v486_v31, 9  ;;  %v4108_v49 = vmax.f32 %v485_v22, %v3074_v36  ;;  %v3068_v22 = vrot.slane %v460_v47, 9  ;;  %v3069_v24 = vrot.slane %v468_v9, 9 }
 0x16f   :  { %v496_v43 = vrot.slane %v488_v37, %v4078_v53  ;;  %v503_v44 = vrot.slane %v489_v38, %v4078_v53  ;;  %v506_v45 = vcombine.low %v402_v33, %v403_v35  ;;  %v507_v46 = vcombine.high %v402_v33, %v403_v35  ;;  %v3557_v38 = vld [vmem:[%s5410_s2 + $0x104] ss:$8 sps:$4 sm:$0xff]   ;;  %v3559_v35 = vld [vmem:[%s5410_s2 + $0x100] ss:$8 sps:$4 sm:$0xff]  }
 0x170   :  { %v4110_v50 = vmax.f32 %v487_v30, %v3075_v39  ;;  %v4112_v51 = vmax.f32 %v486_v31, %v3073_v19  ;;  %v4160_v29 = vmax.f32 %v460_v47, %v3068_v22  ;;  %v3070_v30 = vrot.slane %v4142_v18, 9  ;;  %v3560_v39 = vld [vmem:[%s5410_s2 + $0x114] ss:$8 sps:$4 sm:$0xff]   ;;  %2173 = vmatprep.subr.bf16.mxu1 %v3557_v38  ;;  %v3562_v19 = vld [vmem:[%s5410_s2 + $0x110] ss:$8 sps:$4 sm:$0xff]  }
 0x171   :  { %v514_v52 = vrot.slane %v506_v45, %v4078_v53  ;;  %v3076_v54 = vrot.slane %v496_v43, 9  ;;  %v504_v55 = vcombine.high %v496_v43, %v496_v43  ;;  %v3078_v58 = vrot.slane %v503_v44, 9  ;;  %2174 = vmatpush1.bf16.msra.mxu1 %v3559_v35  ;;  %v3565_v45 = vld [vmem:[%s5410_s2 + $0x120] ss:$8 sps:$4 sm:$0xff]   ;;  %v3566_v47 = vld [vmem:[%s5410_s2 + $0x134] ss:$8 sps:$4 sm:$0xff]  }
 0x172   :  { %v3435_v1 = vpack.i.bf16 %v4110_v50, %v4108_v49  ;;  %v3430_v57 = vpack.i.bf16 %v4112_v51, %v4103_v40  ;;  %v505_v59 = vcombine.high %v503_v44, %v503_v44  ;;  %v4132_v10 = vrot.slane %v507_v46, %v4078_v53  ;;  %2175 = vmatprep.subr.bf16.mxu1 %v3560_v39  ;;  %v3581_v46 = vld [vmem:[%s5410_s2 + $0x10] ss:$8 sps:$4 sm:$0xff]   ;;  %v3611_v22 = vld [vmem:[%s5410_s2 + $0x60] ss:$8 sps:$4 sm:$0xff]   ;;  %v3608_v38 = vld [vmem:[%s5410_s2 + $0x1b4] ss:$8 sps:$4 sm:$0xff]  }
 0x173   :  { %v4121_v61 = vmax.f32 %v496_v43, %v3076_v54  ;;  %v3077_v62 = vrot.slane %v504_v55, 9  ;;  %v522_v63 = vcombine.high %v514_v52, %v514_v52  ;;  %v4134_v11 = vmax.f32 %v503_v44, %v3078_v58  ;;  %v3577_v43 = vld [vmem:[%s5410_s2 + $0x4] ss:$8 sps:$4 sm:$0xff]   ;;  %v3583_v44 = vld [vmem:[%s5410_s2 + $0x14] ss:$8 sps:$4 sm:$0xff]  }
 0x174   :  { %3436 = vrot.lane.b32.xlu0 %v3435_v1, %s3837_s1  ;;  %3431 = vrot.lane.b32.xlu1 %v3430_v57, %s3837_s1  ;;  %v3079_v5 = vrot.slane %v505_v59, 9  ;;  %v3080_v13 = vrot.slane %v514_v52, 9  ;;  %v3082_v27 = vrot.slane %v4132_v10, 9  ;;  %v4164_v31 = vmax.f32 %v468_v9, %v3069_v24  ;;  %v3568_v54 = vld [vmem:[%s5410_s2 + $0x130] ss:$8 sps:$4 sm:$0xff]  }
 0x175   :  { %v3440_v6 = vpack.i.bf16 %v4121_v61, %v4119_v60  ;;  %v4129_v7 = vmax.f32 %v504_v55, %v3077_v62  ;;  %v3081_v17 = vrot.slane %v522_v63, 9  ;;  %v3445_v25 = vpack.i.bf16 %v4134_v11, %v4145_v20  ;;  %2130 = vmatprep.subr.bf16.mxu0 %v3577_v43  ;;  %2176 = vmatpush1.bf16.msra.mxu1 %v3562_v19  ;;  %v3587_v55 = vld [vmem:[%s5410_s2 + $0x20] ss:$8 sps:$4 sm:$0xff]   ;;  %v3595_v1 = vld [vmem:[%s5410_s2 + $0x34] ss:$8 sps:$4 sm:$0xff]  }
 0x176   :  { %v4138_v16 = vmax.f32 %v505_v59, %v3079_v5  ;;  %v4152_v26 = vmax.f32 %v514_v52, %v3080_v13  ;;  %v4169_v33 = vmax.f32 %v4132_v10, %v3082_v27  ;;  %v4175_v36 = vmax.f32 %v4142_v18, %v3070_v30  ;;  %2131 = vmatpush1.bf16.msra.mxu0 %v3575_v42  ;;  %v3589_v52 = vld [vmem:[%s5410_s2 + $0x24] ss:$8 sps:$4 sm:$0xff]   ;;  %v3571_v57 = vld [vmem:[%s5410_s2 + $0x140] ss:$8 sps:$4 sm:$0xff]   ;;  %v3593_v58 = vld [vmem:[%s5410_s2 + $0x30] ss:$8 sps:$4 sm:$0xff]  }
 0x177   :  { %v3450_v2 = vpack.i.bf16 %v4129_v7, %v4125_v3  ;;  %v4157_v28 = vmax.f32 %v522_v63, %v3081_v17  ;;  %2177 = vmatprep.subr.bf16.mxu1 %v3563_v41  ;;  %2132 = vmatprep.subr.bf16.mxu0 %v3583_v44  ;;  %v3572_v59 = vld [vmem:[%s5410_s2 + $0x154] ss:$8 sps:$4 sm:$0xff]   ;;  %v3601_v62 = vld [vmem:[%s5410_s2 + $0x44] ss:$8 sps:$4 sm:$0xff]   ;;  %v3574_v63 = vld [vmem:[%s5410_s2 + $0x150] ss:$8 sps:$4 sm:$0xff]   ;;  %v523_v44 = vcombine.high %v4132_v10, %v4132_v10 }
 0x178   :  { %3441 = vrot.lane.b32.xlu1 %v3440_v6, %s3837_s1  ;;  %v3455_v12 = vpack.i.bf16 %v4138_v16, %v4148_v23  ;;  %v3460_v32 = vpack.i.bf16 %v4152_v26, %v4160_v29  ;;  %v3470_v37 = vpack.i.bf16 %v4169_v33, %v4175_v36  ;;  %v3578_v5 = vld [vmem:[%s5410_s2 + $0x164] ss:$8 sps:$4 sm:$0xff]   ;;  %v3607_v6 = vld [vmem:[%s5410_s2 + $0x54] ss:$8 sps:$4 sm:$0xff]   ;;  %v3605_v9 = vld [vmem:[%s5410_s2 + $0x50] ss:$8 sps:$4 sm:$0xff]  }
 0x179   :  { %3451 = vrot.lane.b32.xlu0 %v3450_v2, %s3837_s1  ;;  %v3465_v34 = vpack.i.bf16 %v4157_v28, %v4164_v31  ;;  %2178 = vmatpush1.bf16.msra.mxu1 %v3565_v45  ;;  %v3584_v13 = vld [vmem:[%s5410_s2 + $0x174] ss:$8 sps:$4 sm:$0xff]   ;;  %v3613_v2 = vld [vmem:[%s5410_s2 + $0x64] ss:$8 sps:$4 sm:$0xff]   ;;  %v3586_v17 = vld [vmem:[%s5410_s2 + $0x170] ss:$8 sps:$4 sm:$0xff]  }
 0x17a   :  { %2133 = vmatpush1.bf16.msra.mxu0 %v3581_v46  ;;  %2179 = vmatprep.subr.bf16.mxu1 %v3566_v47  ;;  %v3590_v24 = vld [vmem:[%s5410_s2 + $0x184] ss:$8 sps:$4 sm:$0xff]   ;;  %v3592_v27 = vld [vmem:[%s5410_s2 + $0x180] ss:$8 sps:$4 sm:$0xff]   ;;  %v3596_v30 = vld [vmem:[%s5410_s2 + $0x194] ss:$8 sps:$4 sm:$0xff]   ;;  %v469_v47 = vcombine.high %v4142_v18, %v4142_v18 }
 0x17b   :  { %2134 = vmatprep.subr.bf16.mxu0 %v3589_v52  ;;  %v3610_v35 = vld [vmem:[%s5410_s2 + $0x1b0] ss:$8 sps:$4 sm:$0xff]   ;;  %v3614_v39 = vld [vmem:[%s5410_s2 + $0x1c4] ss:$8 sps:$4 sm:$0xff]   ;;  %v3616_v19 = vld [vmem:[%s5410_s2 + $0x1c0] ss:$8 sps:$4 sm:$0xff]  }
 0x17c   :  { %3446 = vrot.lane.b32.xlu1 %v3445_v25, %s3837_s1  ;;  %v3619_v25 = vld [vmem:[%s5410_s2 + $0x74] ss:$8 sps:$4 sm:$0xff]   ;;  %v3622_v42 = vld [vmem:[%s5410_s2 + $0x1d0] ss:$8 sps:$4 sm:$0xff]   ;;  %v4327_v18 = vsub.s32 0, %v4075_v48 }
 0x17d   :  { %3456 = vrot.lane.b32.xlu0 %v3455_v12, %s3837_s1  ;;  %2180 = vmatpush1.bf16.msra.mxu1 %v3568_v54  ;;  %v3617_v12 = vld [vmem:[%s5410_s2 + $0x70] ss:$8 sps:$4 sm:$0xff]   ;;  %v3620_v41 = vld [vmem:[%s5410_s2 + $0x1d4] ss:$8 sps:$4 sm:$0xff]  }
 0x17e   :  { %2135 = vmatpush1.bf16.msra.mxu0 %v3587_v55  ;;  %2181 = vmatprep.subr.bf16.mxu1 %v3569_v56  ;;  %v3083_v55 = vrot.slane %v523_v44, 9  ;;  %v3072_v56 = vrot.slane %v4096_v21, 9 }
 0x17f   :  { %2136 = vmatprep.subr.bf16.mxu0 %v3595_v1  ;;  %v3071_v1 = vrot.slane %v469_v47, 9 }
 0x180   :  { %3461 = vrot.lane.b32.xlu1 %v3460_v32, %s3837_s1  ;;  %v3598_v32 = vld [vmem:[%s5410_s2 + $0x190] ss:$8 sps:$4 sm:$0xff]   ;;  %v4324_v10 = vmax.f32 %v4096_v21, %v3072_v56 }
 0x181   :  { %3466 = vrot.lane.b32.xlu0 %v3465_v34, %s3837_s1  ;;  %2182 = vmatpush1.bf16.msra.mxu1 %v3571_v57  ;;  %v3602_v34 = vld [vmem:[%s5410_s2 + $0x1a4] ss:$8 sps:$4 sm:$0xff]   ;;  %v3060_v57 = vrot.slane %v4081_v0, 9 }
 0x182   :  { %2137 = vmatpush1.bf16.msra.mxu0 %v3593_v58  ;;  %2183 = vmatprep.subr.bf16.mxu1 %v3572_v59 }
 0x183   :  { %2138 = vmatprep.subr.bf16.mxu0 %v3601_v62  ;;  %v4321_v62 = vmax.f32 %v523_v44, %v3083_v55 }
 0x184   :  { %3471 = vrot.lane.b32.xlu1 %v3470_v37, %s3837_s1  ;;  %v3604_v37 = vld [vmem:[%s5410_s2 + $0x1a0] ss:$8 sps:$4 sm:$0xff]  }
 0x185   :  { %2184 = vmatpush1.bf16.msra.mxu1 %v3574_v63  ;;  %v4330_v63 = vsub.s32 2, %v4075_v48 }
 0x186   :  { %2139 = vmatpush1.bf16.msra.mxu0 %v3599_v4  ;;  %2185 = vmatprep.subr.bf16.mxu1 %v3578_v5 }
 0x187   :  { %2140 = vmatprep.subr.bf16.mxu0 %v3607_v6 }
 0x189   :  { %2186 = vmatpush1.bf16.msra.mxu1 %v3580_v8 }
 0x18a   :  { %2141 = vmatpush1.bf16.msra.mxu0 %v3605_v9  ;;  %2187 = vmatprep.subr.bf16.mxu1 %v3584_v13  ;;  %v4334_v9 = vmax.f32 %v469_v47, %v3071_v1  ;;  %v4337_v13 = vmax.f32 %v4081_v0, %v3060_v57 }
 0x18b   :  { %2142 = vmatprep.subr.bf16.mxu0 %v3613_v2 }
 0x18d   :  { %2188 = vmatpush1.bf16.msra.mxu1 %v3586_v17 }
 0x18e   :  { %2143 = vmatpush1.bf16.msra.mxu0 %v3611_v22  ;;  %2189 = vmatprep.subr.bf16.mxu1 %v3590_v24 }
 0x18f   :  { %2144 = vmatprep.subr.bf16.mxu0 %v3619_v25 }
 0x191   :  { %2190 = vmatpush1.bf16.msra.mxu1 %v3592_v27 }
 0x192   :  { %2145 = vmatpush1.bf16.msra.mxu0 %v3617_v12  ;;  %2191 = vmatprep.subr.bf16.mxu1 %v3596_v30 }
 0x195   :  { %2192 = vmatpush1.bf16.msra.mxu1 %v3598_v32 }
 0x196   :  { %2193 = vmatprep.subr.bf16.mxu1 %v3602_v34 }
 0x199   :  { %2194 = vmatpush1.bf16.msra.mxu1 %v3604_v37 }
 0x19a   :  { %2195 = vmatprep.subr.bf16.mxu1 %v3608_v38 }
 0x19d   :  { %2196 = vmatpush1.bf16.msra.mxu1 %v3610_v35 }
 0x19e   :  { %2197 = vmatprep.subr.bf16.mxu1 %v3614_v39 }
 0x1a1   :  { %2198 = vmatpush1.bf16.msra.mxu1 %v3616_v19 }
 0x1a2   :  { %2199 = vmatprep.subr.bf16.mxu1 %v3620_v41 }
 0x1a5   :  { %2200 = vmatpush1.bf16.msra.mxu1 %v3622_v42 }
 0x1db   :  { %v3427_v43 = vpop.permute.xlu0 %3426 }
 0x1dc   :  { %v3429_v45 = vunpack.i.h.bf16 %v3427_v43  ;;  %v3428_v46 = vunpack.i.l.bf16 %v3427_v43 }
 0x1de   :  { %v718_v52 = vrot.slane %v3429_v45, 2  ;;  %v717_v54 = vrot.slane %v3428_v46, 2 }
 0x1e0   :  { %v743_v58 = vsel %vm740_vm10, %v3429_v45, %v718_v52  ;;  %v742_v59 = vsel %vm740_vm10, %v3428_v46, %v717_v54 }
 0x1e1   :  { %v791_v4 = vmax.f32 %v4091_v14, %v743_v58  ;;  %v790_v5 = vmax.f32 %v4088_v15, %v742_v59 }
 0x1e3   :  { %v4344_v30 = vrot.slane %v791_v4, %v4327_v18  ;;  %v4347_v0 = vrot.slane %v791_v4, %v4330_v63  ;;  %v4350_v32 = vrot.slane %v790_v5, %v4327_v18  ;;  %v4353_v34 = vrot.slane %v790_v5, %v4330_v63 }
 0x1e5   :  { %5423 = vst [vmem:[#allocation7_spill] sm:$0xff] %v4344_v30  ;;  %5424 = vst [vmem:[#allocation8_spill] sm:$0xff] %v4347_v0  ;;  %v4390_v59 = vsel %vm957_vm11, %v4344_v30, %v4350_v32  ;;  %v4395_v4 = vsel %vm957_vm11, %v4347_v0, %v4353_v34 }
 0x1e6   :  { %v3437_v6 = vpop.permute.xlu0 %3436  ;;  %v3432_v8 = vpop.permute.xlu1 %3431 }
 0x1e7   :  { %v3439_v2 = vunpack.i.h.bf16 %v3437_v6  ;;  %v3438_v21 = vunpack.i.l.bf16 %v3437_v6  ;;  %v3434_v17 = vunpack.i.h.bf16 %v3432_v8  ;;  %v3433_v22 = vunpack.i.l.bf16 %v3432_v8 }
 0x1e9   :  { %v731_v15 = vrot.slane %v3439_v2, 2  ;;  %v730_v25 = vrot.slane %v3438_v21, 2  ;;  %v729_v27 = vrot.slane %v3434_v17, 2  ;;  %v719_v12 = vrot.slane %v3433_v22, 2 }
 0x1ea   :  { %v3442_v37 = vpop.permute.xlu1 %3441 }
 0x1eb   :  { %v756_v38 = vsel %vm740_vm10, %v3439_v2, %v731_v15  ;;  %v755_v35 = vsel %vm740_vm10, %v3438_v21, %v730_v25  ;;  %v754_v39 = vsel %vm740_vm10, %v3434_v17, %v729_v27  ;;  %v744_v19 = vsel %vm740_vm10, %v3433_v22, %v719_v12  ;;  %v3452_v41 = vpop.permute.xlu0 %3451 }
 0x1ec   :  { %v804_v42 = vmax.f32 %v4110_v50, %v756_v38  ;;  %v803_v43 = vmax.f32 %v4108_v49, %v755_v35  ;;  %v802_v44 = vmax.f32 %v4112_v51, %v754_v39  ;;  %v792_v45 = vmax.f32 %v4103_v40, %v744_v19 }
 0x1ed   :  { %v3444_v46 = vunpack.i.h.bf16 %v3442_v37  ;;  %v3443_v47 = vunpack.i.l.bf16 %v3442_v37  ;;  %v3454_v52 = vunpack.i.h.bf16 %v3452_v41  ;;  %v3453_v54 = vunpack.i.l.bf16 %v3452_v41 }
 0x1ee   :  { %v4364_v55 = vrot.slane %v804_v42, %v4327_v18  ;;  %v4367_v56 = vrot.slane %v804_v42, %v4330_v63  ;;  %v4370_v1 = vrot.slane %v803_v43, %v4327_v18  ;;  %v4373_v50 = vrot.slane %v803_v43, %v4330_v63  ;;  %v3447_v58 = vpop.permute.xlu1 %3446 }
 0x1ef   :  { %v4376_v49 = vrot.slane %v802_v44, %v4327_v18  ;;  %v4379_v40 = vrot.slane %v802_v44, %v4330_v63  ;;  %v4382_v51 = vrot.slane %v792_v45, %v4327_v18  ;;  %v4385_v57 = vrot.slane %v792_v45, %v4330_v63  ;;  %v3457_v22 = vpop.permute.xlu0 %3456 }
 0x1f0   :  { %5425 = vst [vmem:[#allocation9_spill] sm:$0xff] %v4370_v1  ;;  %5426 = vst [vmem:[#allocation10_spill] sm:$0xff] %v4373_v50  ;;  %v732_v5 = vrot.slane %v3444_v46, 2  ;;  %v720_v6 = vrot.slane %v3443_v47, 2  ;;  %v4400_v8 = vsel %vm957_vm11, %v4364_v55, %v4370_v1  ;;  %v4405_v2 = vsel %vm957_vm11, %v4367_v56, %v4373_v50 }
 0x1f1   :  { %v1028_v21 = vsel %vm957_vm11, %v4370_v1, %v4376_v49  ;;  %v1035_v17 = vsel %vm957_vm11, %v4373_v50, %v4379_v40  ;;  %v4416_v15 = vsel %vm957_vm11, %v4382_v51, %v4344_v30  ;;  %v4421_v25 = vsel %vm957_vm11, %v4385_v57, %v4347_v0 }
 0x1f2   :  { %v757_v27 = vsel %vm740_vm10, %v3444_v46, %v732_v5  ;;  %v745_v12 = vsel %vm740_vm10, %v3443_v47, %v720_v6  ;;  %v4427_v37 = vsel %vm959_vm12, %v4364_v55, %v1028_v21  ;;  %v733_v35 = vrot.slane %v3454_v52, 2  ;;  %v3462_v5 = vpop.permute.xlu1 %3461 }
 0x1f3   :  { %v805_v38 = vmax.f32 %v4121_v61, %v757_v27  ;;  %v721_v39 = vrot.slane %v3453_v54, 2  ;;  %v3449_v19 = vunpack.i.h.bf16 %v3447_v58  ;;  %v3448_v41 = vunpack.i.l.bf16 %v3447_v58 }
 0x1f4   :  { %v3459_v42 = vunpack.i.h.bf16 %v3457_v22  ;;  %v3458_v43 = vunpack.i.l.bf16 %v3457_v22  ;;  %v1036_v44 = vsel %vm959_vm12, %v4367_v56, %v1035_v17  ;;  %v793_v47 = vmax.f32 %v4119_v60, %v745_v12 }
 0x1f5   :  { %v4433_v45 = vrot.slane %v805_v38, %v4327_v18  ;;  %v4436_v46 = vrot.slane %v805_v38, %v4330_v63  ;;  %v758_v61 = vsel %vm740_vm10, %v3454_v52, %v733_v35  ;;  %v746_v6 = vsel %vm740_vm10, %v3453_v54, %v721_v39 }
 0x1f6   :  { %v734_v58 = vrot.slane %v3449_v19, 2  ;;  %v722_v21 = vrot.slane %v3448_v41, 2  ;;  %v806_v22 = vmax.f32 %v4129_v7, %v758_v61  ;;  %v794_v17 = vmax.f32 %v4125_v3, %v746_v6  ;;  %v3467_v6 = vpop.permute.xlu0 %3466 }
 0x1f7   :  { %v735_v27 = vrot.slane %v3459_v42, 2  ;;  %v723_v14 = vrot.slane %v3458_v43, 2  ;;  %v3464_v48 = vunpack.i.h.bf16 %v3462_v5  ;;  %v3463_v60 = vunpack.i.l.bf16 %v3462_v5 }
 0x1f8   :  { %v759_v24 = vsel %vm740_vm10, %v3449_v19, %v734_v58  ;;  %v747_v38 = vsel %vm740_vm10, %v3448_v41, %v722_v21  ;;  %v4446_v12 = vrot.slane %v793_v47, %v4327_v18  ;;  %v4449_v52 = vrot.slane %v793_v47, %v4330_v63 }
 0x1f9   :  { %v4452_v54 = vrot.slane %v806_v22, %v4327_v18  ;;  %v4455_v3 = vrot.slane %v806_v22, %v4330_v63  ;;  %v807_v7 = vmax.f32 %v4134_v11, %v759_v24  ;;  %v795_v35 = vmax.f32 %v4145_v20, %v747_v38  ;;  %v3472_v24 = vpop.permute.xlu1 %3471 }
 0x1fa   :  { %v760_v39 = vsel %vm740_vm10, %v3459_v42, %v735_v27  ;;  %v748_v19 = vsel %vm740_vm10, %v3458_v43, %v723_v14  ;;  %v736_v5 = vrot.slane %v3464_v48, 2  ;;  %v724_v61 = vrot.slane %v3463_v60, 2 }
 0x1fb   :  { %v808_v41 = vmax.f32 %v4138_v16, %v760_v39  ;;  %v796_v47 = vmax.f32 %v4148_v23, %v748_v19  ;;  %v4464_v58 = vrot.slane %v794_v17, %v4327_v18  ;;  %v4467_v21 = vrot.slane %v794_v17, %v4330_v63  ;;  %v3623_v19 = vld [vmem:[%s5410_s2 + $0x80] ss:$8 sps:$4 sm:$0xff]  }
 0x1fc   :  { %v4470_v11 = vrot.slane %v807_v7, %v4327_v18  ;;  %v4473_v20 = vrot.slane %v807_v7, %v4330_v63  ;;  %v4476_v16 = vrot.slane %v795_v35, %v4327_v18  ;;  %v4479_v23 = vrot.slane %v795_v35, %v4330_v63 }
 0x1fd   :  { %v4482_v14 = vrot.slane %v808_v41, %v4327_v18  ;;  %v4485_v42 = vrot.slane %v808_v41, %v4330_v63  ;;  %v761_v43 = vsel %vm740_vm10, %v3464_v48, %v736_v5  ;;  %v749_v22 = vsel %vm740_vm10, %v3463_v60, %v724_v61  ;;  %v3625_v41 = vld [vmem:[%s5410_s2 + $0x84] ss:$8 sps:$4 sm:$0xff]  }
 0x1fe   :  { %v3469_v17 = vunpack.i.h.bf16 %v3467_v6  ;;  %v3468_v27 = vunpack.i.l.bf16 %v3467_v6  ;;  %v4490_v38 = vrot.slane %v796_v47, %v4327_v18  ;;  %v809_v7 = vmax.f32 %v4152_v26, %v761_v43  ;;  %v3626_v48 = vld [vmem:[%s5410_s2 + $0x1e4] ss:$8 sps:$4 sm:$0xff]   ;;  %v3628_v6 = vld [vmem:[%s5410_s2 + $0x1e0] ss:$8 sps:$4 sm:$0xff]   ;;  %2146 = vmatprep.subr.bf16.mxu0 %v3625_v41 }
 0x1ff   :  { %v3474_v39 = vunpack.i.h.bf16 %v3472_v24  ;;  %v3473_v35 = vunpack.i.l.bf16 %v3472_v24  ;;  %v4503_v60 = vrot.slane %v796_v47, %v4330_v63  ;;  %v1037_v26 = vsel %vm961_vm13, %v4436_v46, %v1036_v44  ;;  %2201 = vmatprep.subr.bf16.mxu1 %v3626_v48  ;;  %2147 = vmatpush1.bf16.msra.mxu0 %v3623_v19 }
 0x200   :  { %v737_v5 = vrot.slane %v3469_v17, 2  ;;  %v725_v61 = vrot.slane %v3468_v27, 2  ;;  %v4511_v24 = vrot.slane %v809_v7, %v4327_v18  ;;  %v4514_v43 = vrot.slane %v809_v7, %v4330_v63  ;;  %2202 = vmatpush1.bf16.msra.mxu1 %v3628_v6 }
 0x201   :  { %v797_v53 = vmax.f32 %v4160_v29, %v749_v22  ;;  %v1022_v47 = vsel %vm959_vm12, %v4385_v57, %v4395_v4  ;;  %v738_v30 = vrot.slane %v3474_v39, 2  ;;  %v726_v50 = vrot.slane %v3473_v35, 2 }
 0x202   :  { %v762_v0 = vsel %vm740_vm10, %v3469_v17, %v737_v5  ;;  %v750_v44 = vsel %vm740_vm10, %v3468_v27, %v725_v61  ;;  %v1023_v29 = vsel %vm961_vm13, %v4449_v52, %v1022_v47  ;;  %v1038_v22 = vsel %vm963_vm14, %v4455_v3, %v1037_v26  ;;  %v3634_v5 = vld [vmem:[%s5410_s2 + $0x1f0] ss:$8 sps:$4 sm:$0xff]  }
 0x203   :  { %v810_v1 = vmax.f32 %v4157_v28, %v762_v0  ;;  %v798_v7 = vmax.f32 %v4164_v31, %v750_v44  ;;  %v763_v4 = vsel %vm740_vm10, %v3474_v39, %v738_v30  ;;  %v751_v17 = vsel %vm740_vm10, %v3473_v35, %v726_v50  ;;  %v3629_v30 = vld [vmem:[%s5410_s2 + $0x90] ss:$8 sps:$4 sm:$0xff]   ;;  %v3631_v50 = vld [vmem:[%s5410_s2 + $0x94] ss:$8 sps:$4 sm:$0xff]  }
 0x204   :  { %v1024_v27 = vsel %vm963_vm14, %v4467_v21, %v1023_v29  ;;  %v1039_v19 = vsel %vm965_vm15, %v4473_v20, %v1038_v22  ;;  %v4535_v28 = vrot.slane %v797_v53, %v4327_v18  ;;  %v4538_v31 = vrot.slane %v797_v53, %v4330_v63  ;;  %v3632_v39 = vld [vmem:[%s5410_s2 + $0x1f4] ss:$8 sps:$4 sm:$0xff]   ;;  %2148 = vmatprep.subr.bf16.mxu0 %v3631_v50 }
 0x205   :  { %v4541_v0 = vrot.slane %v810_v1, %v4327_v18  ;;  %v4544_v41 = vrot.slane %v810_v1, %v4330_v63  ;;  %v4556_v53 = vmax.f32 %v4169_v33, %v763_v4  ;;  %v4559_v35 = vmax.f32 %v4175_v36, %v751_v17  ;;  %2203 = vmatprep.subr.bf16.mxu1 %v3632_v39 }
 0x206   :  { %v1025_v1 = vsel %vm965_vm15, %v4479_v23, %v1024_v27  ;;  %v1040_v48 = vsel %vm967_vm0, %v4485_v42, %v1039_v19  ;;  %v1078_v36 = vsel %vm959_vm12, %v4446_v12, %v4416_v15  ;;  %v1092_v26 = vsel %vm959_vm12, %v4433_v45, %v4400_v8  ;;  %2149 = vmatpush1.bf16.msra.mxu0 %v3629_v30 }
 0x207   :  { %v1026_v61 = vsel %vm967_vm0, %v4503_v60, %v1025_v1  ;;  %v1041_v33 = vsel %vm969_vm1, %v4514_v43, %v1040_v48  ;;  %v4579_v6 = vrot.slane %v798_v7, %v4327_v18  ;;  %v4582_v47 = vrot.slane %v798_v7, %v4330_v63  ;;  %2204 = vmatpush1.bf16.msra.mxu1 %v3634_v5 }
 0x208   :  { %v4586_v44 = vrot.slane %v4556_v53, %v4327_v18  ;;  %v4590_v29 = vrot.slane %v4559_v35, %v4327_v18  ;;  %v1027_v15 = vsel %vm969_vm1, %v4538_v31, %v1026_v61  ;;  %v1079_v8 = vsel %vm961_vm13, %v4464_v58, %v1078_v36 }
 0x209   :  { %v1093_v22 = vsel %vm961_vm13, %v4452_v54, %v1092_v26  ;;  %v1015_v7 = vsel %vm959_vm12, %v4382_v51, %v4390_v59  ;;  %v3475_v4 = vpack.i.bf16 %v1041_v33, %v1027_v15  ;;  %v1080_v17 = vsel %vm963_vm14, %v4476_v16, %v1079_v8 }
 0x20a   :  { %v1094_v27 = vsel %vm963_vm14, %v4470_v11, %v1093_v22  ;;  %v1016_v19 = vsel %vm961_vm13, %v4446_v12, %v1015_v7  ;;  %v1081_v50 = vsel %vm965_vm15, %v4490_v38, %v1080_v17  ;;  %v1030_v30 = vsel %vm961_vm13, %v4433_v45, %v4427_v37 }
 0x20b   :  { %v1095_v39 = vsel %vm965_vm15, %v4482_v14, %v1094_v27  ;;  %v1017_v59 = vsel %vm963_vm14, %v4464_v58, %v1016_v19  ;;  %3476 = vrot.lane.b32.xlu0 %v3475_v4, %s3838_s21  ;;  %v1082_v1 = vsel %vm967_vm0, %v4535_v28, %v1081_v50  ;;  %v1031_v61 = vsel %vm963_vm14, %v4452_v54, %v1030_v30  ;;  %v3637_v4 = vld [vmem:[%s5410_s2 + $0xa4] ss:$8 sps:$4 sm:$0xff]  }
 0x20c   :  { %v1096_v48 = vsel %vm967_vm0, %v4511_v24, %v1095_v39  ;;  %v1018_v5 = vsel %vm965_vm15, %v4476_v16, %v1017_v59  ;;  %v1083_v33 = vsel %vm969_vm1, %v4579_v6, %v1082_v1  ;;  %v1032_v26 = vsel %vm965_vm15, %v4470_v11, %v1031_v61  ;;  %2150 = vmatprep.subr.bf16.mxu0 %v3637_v4 }
 0x20d   :  { %v1097_v37 = vsel %vm969_vm1, %v4541_v0, %v1096_v48  ;;  %v1019_v36 = vsel %vm967_vm0, %v4490_v38, %v1018_v5  ;;  %v1033_v22 = vsel %vm967_vm0, %v4482_v14, %v1032_v26  ;;  %v1085_v7 = vsel %vm959_vm12, %v4449_v52, %v4421_v25  ;;  %v3640_v25 = vld [vmem:[%s5410_s2 + $0x204] ss:$8 sps:$4 sm:$0xff]  }
 0x20e   :  { %v3480_v15 = vpack.i.bf16 %v1097_v37, %v1083_v33  ;;  %v1020_v8 = vsel %vm969_vm1, %v4535_v28, %v1019_v36  ;;  %v1034_v17 = vsel %vm969_vm1, %v4511_v24, %v1033_v22  ;;  %v1086_v27 = vsel %vm961_vm13, %v4467_v21, %v1085_v7  ;;  %v3635_v33 = vld [vmem:[%s5410_s2 + $0xa0] ss:$8 sps:$4 sm:$0xff]   ;;  %2216 = vmatprep.subr.bf16.mxu1 %v3640_v25 }
 0x20f   :  { %v1099_v19 = vsel %vm959_vm12, %v4436_v46, %v4405_v2  ;;  %v1140_v50 = vsel %vm957_vm11, %v4446_v12, %v4382_v51  ;;  %v3485_v39 = vpack.i.bf16 %v1034_v17, %v1020_v8  ;;  %v1087_v59 = vsel %vm963_vm14, %v4479_v23, %v1086_v27  ;;  %2151 = vmatpush1.bf16.msra.mxu0 %v3635_v33 }
 0x210   :  { %3481 = vrot.lane.b32.xlu1 %v3480_v15, %s3839_s27  ;;  %v1100_v30 = vsel %vm961_vm13, %v4455_v3, %v1099_v19  ;;  %v1141_v2 = vsel %vm959_vm12, %v4464_v58, %v1140_v50  ;;  %v1088_v1 = vsel %vm965_vm15, %v4503_v60, %v1087_v59  ;;  %v1154_v61 = vsel %vm957_vm11, %v4433_v45, %v4364_v55 }
 0x211   :  { %v1101_v48 = vsel %vm963_vm14, %v4473_v20, %v1100_v30  ;;  %v1142_v5 = vsel %vm961_vm13, %v4476_v16, %v1141_v2  ;;  %3486 = vrot.lane.b32.xlu0 %v3485_v39, %s3838_s21  ;;  %v1089_v37 = vsel %vm967_vm0, %v4538_v31, %v1088_v1  ;;  %v1155_v15 = vsel %vm959_vm12, %v4452_v54, %v1154_v61 }
 0x212   :  { %v1102_v36 = vsel %vm965_vm15, %v4485_v42, %v1101_v48  ;;  %v1143_v26 = vsel %vm963_vm14, %v4490_v38, %v1142_v5  ;;  %v1090_v8 = vsel %vm969_vm1, %v4582_v47, %v1089_v37  ;;  %v1156_v4 = vsel %vm961_vm13, %v4470_v11, %v1155_v15 }
 0x213   :  { %v1103_v22 = vsel %vm967_vm0, %v4514_v43, %v1102_v36  ;;  %v1144_v7 = vsel %vm965_vm15, %v4535_v28, %v1143_v26  ;;  %v5427_v17 = vpack.i.bf16 %v4321_v62, %v4334_v9  ;;  %v1157_v50 = vsel %vm963_vm14, %v4482_v14, %v1156_v4 }
 0x214   :  { %v1104_v27 = vsel %vm969_vm1, %v4544_v41, %v1103_v22  ;;  %v1145_v19 = vsel %vm967_vm0, %v4579_v6, %v1144_v7  ;;  %v1147_v39 = vsel %vm957_vm11, %v4449_v52, %v4385_v57  ;;  %v1158_v30 = vsel %vm965_vm15, %v4511_v24, %v1157_v50  ;;  %v3641_v50 = vld [vmem:[%s5410_s2 + $0xb0] ss:$8 sps:$4 sm:$0xff]  }
 0x215   :  { %3491 = vrot.lane.b32.xlu1 %v5427_v17, %s3837_s1  ;;  %v3495_v59 = vpack.i.bf16 %v1104_v27, %v1090_v8  ;;  %v1146_v25 = vsel %vm969_vm1, %v4590_v29, %v1145_v19  ;;  %v1148_v2 = vsel %vm959_vm12, %v4467_v21, %v1147_v39  ;;  %v1131_v1 = vrot.slane %v4559_v35, %v4330_v63  ;;  %v3643_v39 = vld [vmem:[%s5410_s2 + $0xb4] ss:$8 sps:$4 sm:$0xff]  }
 0x216   :  { %v1159_v48 = vsel %vm967_vm0, %v4541_v0, %v1158_v30  ;;  %v1149_v5 = vsel %vm961_vm13, %v4479_v23, %v1148_v2  ;;  %v1161_v61 = vsel %vm957_vm11, %v4436_v46, %v4367_v56  ;;  %v1139_v37 = vrot.slane %v4556_v53, %v4330_v63  ;;  %2152 = vmatprep.subr.bf16.mxu0 %v3643_v39 }
 0x217   :  { %3496 = vrot.lane.b32.xlu0 %v3495_v59, %s3839_s27  ;;  %v1160_v33 = vsel %vm969_vm1, %v4586_v44, %v1159_v48  ;;  %v1150_v35 = vsel %vm963_vm14, %v4503_v60, %v1149_v5  ;;  %v1162_v36 = vsel %vm959_vm12, %v4455_v3, %v1161_v61  ;;  %v1210_v53 = vsel %vm957_vm11, %v4467_v21, %v4449_v52 }
 0x218   :  { %v3500_v26 = vpack.i.bf16 %v1160_v33, %v1146_v25  ;;  %v1151_v15 = vsel %vm965_vm15, %v4538_v31, %v1150_v35  ;;  %v1163_v8 = vsel %vm961_vm13, %v4473_v20, %v1162_v36  ;;  %v1211_v4 = vsel %vm959_vm12, %v4479_v23, %v1210_v53  ;;  %v3649_v33 = vld [vmem:[%s5410_s2 + $0xc4] ss:$8 sps:$4 sm:$0xff]   ;;  %2153 = vmatpush1.bf16.msra.mxu0 %v3641_v50 }
 0x219   :  { %v1152_v22 = vsel %vm967_vm0, %v4582_v47, %v1151_v15  ;;  %v1164_v7 = vsel %vm963_vm14, %v4485_v42, %v1163_v8  ;;  %v1224_v17 = vsel %vm957_vm11, %v4455_v3, %v4436_v46  ;;  %v1212_v59 = vsel %vm961_vm13, %v4503_v60, %v1211_v4  ;;  %v3647_v15 = vld [vmem:[%s5410_s2 + $0xc0] ss:$8 sps:$4 sm:$0xff]   ;;  %2154 = vmatprep.subr.bf16.mxu0 %v3649_v33 }
 0x21a   :  { %3501 = vrot.lane.b32.xlu1 %v3500_v26, %s3840_s30  ;;  %v1153_v27 = vsel %vm969_vm1, %v1131_v1, %v1152_v22  ;;  %v1165_v19 = vsel %vm965_vm15, %v4514_v43, %v1164_v7  ;;  %v1225_v25 = vsel %vm959_vm12, %v4473_v20, %v1224_v17  ;;  %v5428_v30 = vpack.i.bf16 %v4324_v10, %v4337_v13 }
 0x21b   :  { %v1166_v2 = vsel %vm967_vm0, %v4544_v41, %v1165_v19  ;;  %v1213_v48 = vsel %vm963_vm14, %v4538_v31, %v1212_v59  ;;  %v1226_v5 = vsel %vm961_vm13, %v4485_v42, %v1225_v25  ;;  %v1203_v31 = vsel %vm957_vm11, %v4464_v58, %v4446_v12 }
 0x21c   :  { %3506 = vrot.lane.b32.xlu0 %v5428_v30, %s3837_s1  ;;  %v1167_v61 = vsel %vm969_vm1, %v1139_v37, %v1166_v2  ;;  %v1214_v35 = vsel %vm965_vm15, %v4582_v47, %v1213_v48  ;;  %v1227_v36 = vsel %vm963_vm14, %v4514_v43, %v1226_v5  ;;  %v1204_v47 = vsel %vm959_vm12, %v4476_v16, %v1203_v31 }
 0x21d   :  { %v3510_v26 = vpack.i.bf16 %v1167_v61, %v1153_v27  ;;  %v4783_v8 = vsel %vm967_vm0, %v1131_v1, %v1214_v35  ;;  %v1228_v53 = vsel %vm965_vm15, %v4544_v41, %v1227_v36  ;;  %v1205_v22 = vsel %vm961_vm13, %v4490_v38, %v1204_v47  ;;  %v3655_v1 = vld [vmem:[%s5410_s2 + $0xd4] ss:$8 sps:$4 sm:$0xff]   ;;  %2155 = vmatpush1.bf16.msra.mxu0 %v3647_v15 }
 0x21e   :  { %v4790_v43 = vsel %vm967_vm0, %v1139_v37, %v1228_v53  ;;  %v1217_v7 = vsel %vm957_vm11, %v4452_v54, %v4433_v45  ;;  %v1206_v41 = vsel %vm963_vm14, %v4535_v28, %v1205_v22  ;;  %v3653_v28 = vld [vmem:[%s5410_s2 + $0xd0] ss:$8 sps:$4 sm:$0xff]   ;;  %2156 = vmatprep.subr.bf16.mxu0 %v3655_v1  ;;  %v3638_v22 = vld [vmem:[%s5410_s2 + $0x200] ss:$8 sps:$4 sm:$0xff]  }
 0x21f   :  { %3511 = vrot.lane.b32.xlu1 %v3510_v26, %s3840_s30  ;;  %v1218_v4 = vsel %vm959_vm12, %v4470_v11, %v1217_v7  ;;  %v1207_v37 = vsel %vm965_vm15, %v4579_v6, %v1206_v41  ;;  %v3661_v6 = vld [vmem:[%s5410_s2 + $0xe4] ss:$8 sps:$4 sm:$0xff]  }
 0x220   :  { %v1219_v17 = vsel %vm961_vm13, %v4482_v14, %v1218_v4  ;;  %v4810_v27 = vsel %vm967_vm0, %v4590_v29, %v1207_v37  ;;  %v3667_v29 = vld [vmem:[%s5410_s2 + $0xf4] ss:$8 sps:$4 sm:$0xff]  }
 0x221   :  { %v1220_v19 = vsel %vm963_vm14, %v4511_v24, %v1219_v17  ;;  %2157 = vmatpush1.bf16.msra.mxu0 %v3653_v28  ;;  %v3659_v24 = vld [vmem:[%s5410_s2 + $0xe0] ss:$8 sps:$4 sm:$0xff]   ;;  %v3646_v4 = vld [vmem:[%s5410_s2 + $0x214] ss:$8 sps:$4 sm:$0xff]  }
 0x222   :  { %v1221_v50 = vsel %vm965_vm15, %v4541_v0, %v1220_v19  ;;  %2158 = vmatprep.subr.bf16.mxu0 %v3661_v6  ;;  %v3665_v0 = vld [vmem:[%s5410_s2 + $0xf0] ss:$8 sps:$4 sm:$0xff]  }
 0x223   :  { %v4824_v39 = vsel %vm967_vm0, %v4586_v44, %v1221_v50  ;;  %v3730_v44 = vld [vmem:[%s5410_s2 + $0x404] ss:$8 sps:$4 sm:$0xff]  }
 0x225   :  { %2159 = vmatpush1.bf16.msra.mxu0 %v3659_v24 }
 0x226   :  { %2160 = vmatprep.subr.bf16.mxu0 %v3667_v29  ;;  %v3644_v29 = vld [vmem:[%s5410_s2 + $0x210] ss:$8 sps:$4 sm:$0xff]  }
 0x229   :  { %2161 = vmatpush1.bf16.msra.mxu0 %v3665_v0 }
 0x22a   :  { %2302 = vmatprep.subr.bf16.mxu0 %v3730_v44 }
 0x27d   :  { %v3477_v59 = vpop.permute.xlu0 %3476 }
 0x27e   :  { %v3479_v30 = vunpack.i.h.bf16 %v3477_v59  ;;  %v3478_v2 = vunpack.i.l.bf16 %v3477_v59 }
 0x282   :  { %v3482_v25 = vpop.permute.xlu1 %3481 }
 0x283   :  { %v3484_v48 = vunpack.i.h.bf16 %v3482_v25  ;;  %v3483_v5 = vunpack.i.l.bf16 %v3482_v25  ;;  %v4838_v61 = vpop.permute.xlu0 %3486  ;;  %v3652_v25 = vld [vmem:[%s5410_s2 + $0x224] ss:$8 sps:$4 sm:$0xff]  }
 0x284   :  { %v3489_v33 = vunpack.i.h.bf16 %v4838_v61  ;;  %v3488_v35 = vunpack.i.l.bf16 %v4838_v61  ;;  %v3736_v61 = vld [vmem:[%s5410_s2 + $0x414] ss:$8 sps:$4 sm:$0xff]  }
 0x285   :  { %v1248_v36 = vsel %vm1113_vm2, %v3478_v2, %v3483_v5  ;;  %v1249_v31 = vsel %vm1113_vm2, %v3479_v30, %v3484_v48 }
 0x286   :  { %v1260_v15 = vpack.c.bf16 %v1249_v31, %v1248_v36  ;;  %v1051_v7 = vsel %vm1050_vm3, %v3488_v35, %v3478_v2  ;;  %v1052_v1 = vsel %vm1050_vm3, %v3489_v33, %v3479_v30 }
 0x287   :  { %v3492_v26 = vpop.permute.xlu1 %3491  ;;  %v1259_v41 = vpack.c.bf16 %v1052_v1, %v1051_v7  ;;  %v3650_v1 = vld [vmem:[%s5410_s2 + $0x220] ss:$8 sps:$4 sm:$0xff]  }
 0x288   :  { %v3494_v53 = vunpack.i.h.bf16 %v3492_v26  ;;  %v3493_v47 = vunpack.i.l.bf16 %v3492_v26  ;;  %2205 = vmatprep.mubr.bf16.mxu1 %v1260_v15 }
 0x289   :  { %v3497_v19 = vpop.permute.xlu0 %3496  ;;  %2206 = vmatmul.mubr.bf16.vlgmr.msra.gmra.mrb[0].mxu1 %v1259_v41 }
 0x28a   :  { %v739_v37 = vrot.slane %v3494_v53, 2  ;;  %v727_v17 = vrot.slane %v3493_v47, 2  ;;  %v3499_v28 = vunpack.i.h.bf16 %v3497_v19  ;;  %v3498_v50 = vunpack.i.l.bf16 %v3497_v19  ;;  %2217 = vmatpush1.bf16.msra.mxu1 %v3638_v22 }
 0x28b   :  { %2218 = vmatprep.subr.bf16.mxu1 %v3646_v4 }
 0x28c   :  { %v764_v6 = vsel %vm740_vm10, %v3494_v53, %v739_v37  ;;  %v752_v24 = vsel %vm740_vm10, %v3493_v47, %v727_v17  ;;  %v3502_v59 = vpop.permute.xlu1 %3501  ;;  %v4867_v30 = vsel %vm1113_vm2, %v3483_v5, %v3498_v50  ;;  %v4870_v2 = vsel %vm1113_vm2, %v3484_v48, %v3499_v28 }
 0x28d   :  { %v812_v0 = vmax.f32 %v4321_v62, %v764_v6  ;;  %v800_v44 = vmax.f32 %v4334_v9, %v752_v24  ;;  %v3504_v36 = vunpack.i.h.bf16 %v3502_v59  ;;  %v3503_v31 = vunpack.i.l.bf16 %v3502_v59 }
 0x28e   :  { %v3507_v26 = vpop.permute.xlu0 %3506  ;;  %v1261_v62 = vpack.c.bf16 %v4870_v2, %v4867_v30  ;;  %2219 = vmatpush1.bf16.msra.mxu1 %v3644_v29  ;;  %v3658_v29 = vld [vmem:[%s5410_s2 + $0x234] ss:$8 sps:$4 sm:$0xff]   ;;  %v3710_v2 = vld [vmem:[%s5410_s2 + $0x330] ss:$8 sps:$4 sm:$0xff]  }
 0x28f   :  { %v1198_v9 = vrot.slane %v812_v0, %v4327_v18  ;;  %v1202_v15 = vrot.slane %v812_v0, %v4330_v63  ;;  %v1190_v53 = vrot.slane %v800_v44, %v4327_v18  ;;  %v1194_v47 = vrot.slane %v800_v44, %v4330_v63  ;;  %2220 = vmatprep.subr.bf16.mxu1 %v3652_v25  ;;  %v3712_v30 = vld [vmem:[%s5410_s2 + $0x334] ss:$8 sps:$4 sm:$0xff]  }
 0x290   :  { %v3509_v22 = vunpack.i.h.bf16 %v3507_v26  ;;  %v3508_v5 = vunpack.i.l.bf16 %v3507_v26  ;;  %v1250_v48 = vsel %vm1176_vm4, %v3498_v50, %v3503_v31  ;;  %v1251_v7 = vsel %vm1176_vm4, %v3499_v28, %v3504_v36 }
 0x291   :  { %v1262_v41 = vpack.c.bf16 %v1251_v7, %v1250_v48  ;;  %v1216_v4 = vsel %vm969_vm1, %v1194_v47, %v4783_v8  ;;  %v1230_v37 = vsel %vm969_vm1, %v1202_v15, %v4790_v43  ;;  %v1209_v17 = vsel %vm969_vm1, %v1190_v53, %v4810_v27  ;;  %v4889_v50 = vpop.permute.xlu1 %3511  ;;  %v3664_v15 = vld [vmem:[%s5410_s2 + $0x244] ss:$8 sps:$4 sm:$0xff]  }
 0x292   :  { %v728_v19 = vrot.slane %v3509_v22, 2  ;;  %v716_v6 = vrot.slane %v3508_v5, 2  ;;  %v3520_v28 = vpack.i.bf16 %v1230_v37, %v1216_v4  ;;  %v1223_v24 = vsel %vm969_vm1, %v1198_v9, %v4824_v39  ;;  %2221 = vmatpush1.bf16.msra.mxu1 %v3650_v1  ;;  %v3656_v39 = vld [vmem:[%s5410_s2 + $0x230] ss:$8 sps:$4 sm:$0xff]  }
 0x293   :  { %v3514_v8 = vunpack.i.h.bf16 %v4889_v50  ;;  %v3513_v0 = vunpack.i.l.bf16 %v4889_v50  ;;  %2248 = vmatprep.mubr.bf16.mxu1 %v1262_v41  ;;  %v3515_v43 = vpack.i.bf16 %v1223_v24, %v1209_v17  ;;  %2222 = vmatprep.subr.bf16.mxu1 %v3658_v29  ;;  %v5430_v41 = vld [vmem:[#allocation10_spill] sm:$0xff]  ;;  %v5431_v4 = vld [vmem:[#allocation7_spill] sm:$0xff]  ;;  %v5432_v37 = vld [vmem:[#allocation8_spill] sm:$0xff] }
 0x294   :  { %v753_v27 = vsel %vm740_vm10, %v3509_v22, %v728_v19  ;;  %v741_v44 = vsel %vm740_vm10, %v3508_v5, %v716_v6  ;;  %3521 = vrot.lane.b32.xlu1 %v3520_v28, %s3841_s14  ;;  %v3668_v28 = vld [vmem:[%s5410_s2 + $0x250] ss:$8 sps:$4 sm:$0xff]   ;;  %vm2600_vm10 = vcmask 293888  }
 0x295   :  { %v801_v59 = vmax.f32 %v4324_v10, %v753_v27  ;;  %v789_v25 = vmax.f32 %v4337_v13, %v741_v44  ;;  %v4909_v26 = vsel %vm1176_vm4, %v3503_v31, %v3513_v0  ;;  %v4914_v9 = vsel %vm1176_vm4, %v3504_v36, %v3514_v8  ;;  %3516 = vrot.lane.b32.xlu0 %v3515_v43, %s3841_s14  ;;  %v3662_v36 = vld [vmem:[%s5410_s2 + $0x240] ss:$8 sps:$4 sm:$0xff]   ;;  %v3734_v44 = vld [vmem:[%s5410_s2 + $0x410] ss:$8 sps:$4 sm:$0xff]  }
 0x296   :  { %v1263_v10 = vpack.c.bf16 %v4914_v9, %v4909_v26  ;;  %2223 = vmatpush1.bf16.msra.mxu1 %v3656_v39  ;;  %v3742_v39 = vld [vmem:[%s5410_s2 + $0x424] ss:$8 sps:$4 sm:$0xff]  }
 0x297   :  { %v896_v13 = vrot.slane %v801_v59, %v4327_v18  ;;  %v900_v31 = vrot.slane %v801_v59, %v4330_v63  ;;  %v832_v53 = vrot.slane %v789_v25, %v4327_v18  ;;  %v836_v47 = vrot.slane %v789_v25, %v4330_v63  ;;  %2224 = vmatprep.subr.bf16.mxu1 %v3664_v15  ;;  %v3670_v18 = vld [vmem:[%s5410_s2 + $0x254] ss:$8 sps:$4 sm:$0xff]   ;;  %v5429_v63 = vld [vmem:[#allocation9_spill] sm:$0xff] }
 0x298   :  { %v3842_v59 = vmov 0   ;;  %v3677_v25 = vld [vmem:[%s5410_s2 + $0x280] ss:$8 sps:$4 sm:$0xff]   ;;  %v3682_v15 = vld [vmem:[%s5410_s2 + $0x294] ss:$8 sps:$4 sm:$0xff]  }
 0x299   :  { %v978_v22 = vsel %vm957_vm11, %v4376_v49, %v896_v13  ;;  %v985_v5 = vsel %vm957_vm11, %v4379_v40, %v900_v31  ;;  %v958_v48 = vsel %vm957_vm11, %v4350_v32, %v832_v53  ;;  %v971_v7 = vsel %vm957_vm11, %v4353_v34, %v836_v47  ;;  %v3740_v13 = vld [vmem:[%s5410_s2 + $0x420] ss:$8 sps:$4 sm:$0xff]   ;;  %v3748_v31 = vld [vmem:[%s5410_s2 + $0x434] ss:$8 sps:$4 sm:$0xff]   ;;  %v3680_v53 = vld [vmem:[%s5410_s2 + $0x290] ss:$8 sps:$4 sm:$0xff]  }
 0x29a   :  { %v979_v1 = vsel %vm959_vm12, %v5429_v63, %v978_v22  ;;  %v986_v49 = vsel %vm959_vm12, %v5430_v41, %v985_v5  ;;  %v960_v40 = vsel %vm959_vm12, %v5431_v4, %v958_v48  ;;  %v972_v32 = vsel %vm959_vm12, %v5432_v37, %v971_v7  ;;  %2225 = vmatpush1.bf16.msra.mxu1 %v3662_v36  ;;  %v3685_v47 = vld [vmem:[%s5410_s2 + $0x2a4] ss:$8 sps:$4 sm:$0xff]   ;;  %v3746_v36 = vld [vmem:[%s5410_s2 + $0x430] ss:$8 sps:$4 sm:$0xff]   ;;  %v3683_v5 = vld [vmem:[%s5410_s2 + $0x2a0] ss:$8 sps:$4 sm:$0xff]  }
 0x29b   :  { %v980_v34 = vsel %vm961_vm13, %v4364_v55, %v979_v1  ;;  %v962_v17 = vsel %vm961_vm13, %v4382_v51, %v960_v40  ;;  %v973_v19 = vsel %vm961_vm13, %v4385_v57, %v972_v32  ;;  %v987_v6 = vsel %vm961_vm13, %v4367_v56, %v986_v49  ;;  %2226 = vmatprep.subr.bf16.mxu1 %v3670_v18  ;;  %v3754_v22 = vld [vmem:[%s5410_s2 + $0x444] ss:$8 sps:$4 sm:$0xff]   ;;  %v3688_v48 = vld [vmem:[%s5410_s2 + $0x2b4] ss:$8 sps:$4 sm:$0xff]   ;;  %v3752_v7 = vld [vmem:[%s5410_s2 + $0x440] ss:$8 sps:$4 sm:$0xff]  }
 0x29c   :  { %v974_v24 = vsel %vm963_vm14, %v4449_v52, %v973_v19  ;;  %v988_v55 = vsel %vm963_vm14, %v4436_v46, %v987_v6  ;;  %v964_v51 = vsel %vm963_vm14, %v4446_v12, %v962_v17  ;;  %v981_v57 = vsel %vm963_vm14, %v4433_v45, %v980_v34  ;;  %v3673_v46 = vld [vmem:[%s5410_s2 + $0x264] ss:$8 sps:$4 sm:$0xff]   ;;  %v3760_v18 = vld [vmem:[%s5410_s2 + $0x454] ss:$8 sps:$4 sm:$0xff]   ;;  %v3686_v63 = vld [vmem:[%s5410_s2 + $0x2b0] ss:$8 sps:$4 sm:$0xff]  }
 0x29d   :  { %v975_v56 = vsel %vm965_vm15, %v4467_v21, %v974_v24  ;;  %v989_v29 = vsel %vm965_vm15, %v4455_v3, %v988_v55  ;;  %v966_v43 = vsel %vm965_vm15, %v4464_v58, %v964_v51  ;;  %v982_v52 = vsel %vm965_vm15, %v4452_v54, %v981_v57  ;;  %v3691_v1 = vld [vmem:[%s5410_s2 + $0x2c4] ss:$8 sps:$4 sm:$0xff]   ;;  %v3758_v41 = vld [vmem:[%s5410_s2 + $0x450] ss:$8 sps:$4 sm:$0xff]   ;;  %v3689_v4 = vld [vmem:[%s5410_s2 + $0x2c0] ss:$8 sps:$4 sm:$0xff]  }
 0x29e   :  { %v976_v45 = vsel %vm967_vm0, %v4479_v23, %v975_v56  ;;  %v990_v12 = vsel %vm967_vm0, %v4473_v20, %v989_v29  ;;  %v968_v21 = vsel %vm967_vm0, %v4476_v16, %v966_v43  ;;  %v983_v3 = vsel %vm967_vm0, %v4470_v11, %v982_v52  ;;  %2227 = vmatpush1.bf16.msra.mxu1 %v3668_v28  ;;  %v3671_v16 = vld [vmem:[%s5410_s2 + $0x260] ss:$8 sps:$4 sm:$0xff]   ;;  %v3766_v49 = vld [vmem:[%s5410_s2 + $0x464] ss:$8 sps:$4 sm:$0xff]   ;;  %v3694_v40 = vld [vmem:[%s5410_s2 + $0x2d4] ss:$8 sps:$4 sm:$0xff]  }
 0x29f   :  { %v977_v58 = vsel %vm969_vm1, %v4503_v60, %v976_v45  ;;  %v991_v54 = vsel %vm969_vm1, %v4485_v42, %v990_v12  ;;  %v970_v27 = vsel %vm969_vm1, %v4490_v38, %v968_v21  ;;  %v984_v23 = vsel %vm969_vm1, %v4482_v14, %v983_v3  ;;  %2228 = vmatprep.subr.bf16.mxu1 %v3673_v46  ;;  %v3676_v38 = vld [vmem:[%s5410_s2 + $0x274] ss:$8 sps:$4 sm:$0xff]   ;;  %v3728_v14 = vld [vmem:[%s5410_s2 + $0x400] ss:$8 sps:$4 sm:$0xff]   ;;  %v3692_v34 = vld [vmem:[%s5410_s2 + $0x2d0] ss:$8 sps:$4 sm:$0xff]  }
 0x2a0   :  { %v1246_v20 = vsel %vm1050_vm3, %v977_v58, %v3488_v35  ;;  %v1247_v11 = vsel %vm1050_vm3, %v991_v54, %v3489_v33  ;;  %v1257_v60 = vpack.c.bf16 %v984_v23, %v970_v27  ;;  %v3674_v33 = vld [vmem:[%s5410_s2 + $0x270] ss:$8 sps:$4 sm:$0xff]   ;;  %v3679_v35 = vld [vmem:[%s5410_s2 + $0x284] ss:$8 sps:$4 sm:$0xff]   ;;  %v3764_v37 = vld [vmem:[%s5410_s2 + $0x460] ss:$8 sps:$4 sm:$0xff]  }
 0x2a1   :  { %v1258_v42 = vpack.c.bf16 %v1247_v11, %v1246_v20  ;;  %v3772_v32 = vld [vmem:[%s5410_s2 + $0x474] ss:$8 sps:$4 sm:$0xff]   ;;  %v3697_v17 = vld [vmem:[%s5410_s2 + $0x2e4] ss:$8 sps:$4 sm:$0xff]   ;;  %v3770_v19 = vld [vmem:[%s5410_s2 + $0x470] ss:$8 sps:$4 sm:$0xff]  }
 0x2a2   :  { %2229 = vmatpush1.bf16.msra.mxu1 %v3671_v16  ;;  %v3695_v6 = vld [vmem:[%s5410_s2 + $0x2e0] ss:$8 sps:$4 sm:$0xff]   ;;  %v3700_v28 = vld [vmem:[%s5410_s2 + $0x2f4] ss:$8 sps:$4 sm:$0xff]   ;;  %v3698_v24 = vld [vmem:[%s5410_s2 + $0x2f0] ss:$8 sps:$4 sm:$0xff]  }
 0x2a3   :  { %2162 = vmatprep.mubr.bf16.mxu0 %v1258_v42  ;;  %2230 = vmatprep.subr.bf16.mxu1 %v3676_v38  ;;  %v3703_v55 = vld [vmem:[%s5410_s2 + $0x304] ss:$8 sps:$4 sm:$0xff]   ;;  %v3701_v51 = vld [vmem:[%s5410_s2 + $0x300] ss:$8 sps:$4 sm:$0xff]   ;;  %v3706_v57 = vld [vmem:[%s5410_s2 + $0x314] ss:$8 sps:$4 sm:$0xff]  }
 0x2a4   :  { %2163 = vmatmul.mubr.bf16.vlgmr.msra.gmra.mrb[12].mxu0 %v1257_v60  ;;  %v3704_v56 = vld [vmem:[%s5410_s2 + $0x310] ss:$8 sps:$4 sm:$0xff]   ;;  %v3709_v29 = vld [vmem:[%s5410_s2 + $0x324] ss:$8 sps:$4 sm:$0xff]   ;;  %v3707_v43 = vld [vmem:[%s5410_s2 + $0x320] ss:$8 sps:$4 sm:$0xff]  }
 0x2a5   :  { %2303 = vmatpush1.bf16.msra.mxu0 %v3728_v14  ;;  %2334 = vmatprep.mubr.bf16.mxu0 %v3842_v59  ;;  %v3713_v52 = vld [vmem:[%s5410_s2 + $0x340] ss:$8 sps:$4 sm:$0xff]   ;;  %v3718_v46 = vld [vmem:[%s5410_s2 + $0x354] ss:$8 sps:$4 sm:$0xff]   ;;  %v3716_v45 = vld [vmem:[%s5410_s2 + $0x350] ss:$8 sps:$4 sm:$0xff]  }
 0x2a6   :  { %2304 = vmatprep.subr.bf16.mxu0 %v3736_v61  ;;  %2231 = vmatpush1.bf16.msra.mxu1 %v3674_v33  ;;  %v3721_v12 = vld [vmem:[%s5410_s2 + $0x364] ss:$8 sps:$4 sm:$0xff]   ;;  %v3719_v21 = vld [vmem:[%s5410_s2 + $0x360] ss:$8 sps:$4 sm:$0xff]   ;;  %v3724_v3 = vld [vmem:[%s5410_s2 + $0x374] ss:$8 sps:$4 sm:$0xff]  }
 0x2a7   :  { %2232 = vmatprep.subr.bf16.mxu1 %v3679_v35  ;;  %v3722_v58 = vld [vmem:[%s5410_s2 + $0x370] ss:$8 sps:$4 sm:$0xff]   ;;  %v3727_v54 = vld [vmem:[%s5410_s2 + $0x384] ss:$8 sps:$4 sm:$0xff]   ;;  %v3725_v27 = vld [vmem:[%s5410_s2 + $0x380] ss:$8 sps:$4 sm:$0xff]  }
 0x2a8   :  { %v3733_v23 = vld [vmem:[%s5410_s2 + $0x394] ss:$8 sps:$4 sm:$0xff]   ;;  %v3731_v20 = vld [vmem:[%s5410_s2 + $0x390] ss:$8 sps:$4 sm:$0xff]   ;;  %v3739_v11 = vld [vmem:[%s5410_s2 + $0x3a4] ss:$8 sps:$4 sm:$0xff]  }
 0x2a9   :  { %2305 = vmatpush1.bf16.msra.mxu0 %v3734_v44  ;;  %v3737_v16 = vld [vmem:[%s5410_s2 + $0x3a0] ss:$8 sps:$4 sm:$0xff]   ;;  %v3745_v42 = vld [vmem:[%s5410_s2 + $0x3b4] ss:$8 sps:$4 sm:$0xff]   ;;  %v3743_v38 = vld [vmem:[%s5410_s2 + $0x3b0] ss:$8 sps:$4 sm:$0xff]  }
 0x2aa   :  { %2306 = vmatprep.subr.bf16.mxu0 %v3742_v39  ;;  %2233 = vmatpush1.bf16.msra.mxu1 %v3677_v25  ;;  %v3751_v14 = vld [vmem:[%s5410_s2 + $0x3c4] ss:$8 sps:$4 sm:$0xff]   ;;  %v3749_v60 = vld [vmem:[%s5410_s2 + $0x3c0] ss:$8 sps:$4 sm:$0xff]   ;;  %v3757_v61 = vld [vmem:[%s5410_s2 + $0x3d4] ss:$8 sps:$4 sm:$0xff]  }
 0x2ab   :  { %2234 = vmatprep.subr.bf16.mxu1 %v3682_v15  ;;  %v3755_v33 = vld [vmem:[%s5410_s2 + $0x3d0] ss:$8 sps:$4 sm:$0xff]   ;;  %v3763_v35 = vld [vmem:[%s5410_s2 + $0x3e4] ss:$8 sps:$4 sm:$0xff]   ;;  %v3761_v44 = vld [vmem:[%s5410_s2 + $0x3e0] ss:$8 sps:$4 sm:$0xff]  }
 0x2ac   :  { %v3769_v39 = vld [vmem:[%s5410_s2 + $0x3f4] ss:$8 sps:$4 sm:$0xff]   ;;  %v3767_v59 = vld [vmem:[%s5410_s2 + $0x3f0] ss:$8 sps:$4 sm:$0xff]  }
 0x2ad   :  { %2307 = vmatpush1.bf16.msra.mxu0 %v3740_v13 }
 0x2ae   :  { %2308 = vmatprep.subr.bf16.mxu0 %v3748_v31  ;;  %2235 = vmatpush1.bf16.msra.mxu1 %v3680_v53 }
 0x2af   :  { %2236 = vmatprep.subr.bf16.mxu1 %v3685_v47 }
 0x2b1   :  { %2309 = vmatpush1.bf16.msra.mxu0 %v3746_v36 }
 0x2b2   :  { %2310 = vmatprep.subr.bf16.mxu0 %v3754_v22  ;;  %2237 = vmatpush1.bf16.msra.mxu1 %v3683_v5 }
 0x2b3   :  { %2238 = vmatprep.subr.bf16.mxu1 %v3688_v48 }
 0x2b5   :  { %2311 = vmatpush1.bf16.msra.mxu0 %v3752_v7 }
 0x2b6   :  { %2312 = vmatprep.subr.bf16.mxu0 %v3760_v18  ;;  %2239 = vmatpush1.bf16.msra.mxu1 %v3686_v63 }
 0x2b7   :  { %2240 = vmatprep.subr.bf16.mxu1 %v3691_v1 }
 0x2b9   :  { %2313 = vmatpush1.bf16.msra.mxu0 %v3758_v41 }
 0x2ba   :  { %2314 = vmatprep.subr.bf16.mxu0 %v3766_v49  ;;  %2241 = vmatpush1.bf16.msra.mxu1 %v3689_v4 }
 0x2bb   :  { %2242 = vmatprep.subr.bf16.mxu1 %v3694_v40 }
 0x2bd   :  { %2315 = vmatpush1.bf16.msra.mxu0 %v3764_v37 }
 0x2be   :  { %2316 = vmatprep.subr.bf16.mxu0 %v3772_v32  ;;  %2243 = vmatpush1.bf16.msra.mxu1 %v3692_v34 }
 0x2bf   :  { %2244 = vmatprep.subr.bf16.mxu1 %v3697_v17 }
 0x2c1   :  { %2317 = vmatpush1.bf16.msra.mxu0 %v3770_v19 }
 0x2c2   :  { %2245 = vmatpush1.bf16.msra.mxu1 %v3695_v6 }
 0x2c3   :  { %2246 = vmatprep.subr.bf16.mxu1 %v3700_v28 }
 0x2c6   :  { %2247 = vmatpush1.bf16.msra.mxu1 %v3698_v24 }
 0x2c7   :  { %2259 = vmatprep.subr.bf16.mxu1 %v3703_v55 }
 0x2c9   :  { %2249 = vmatmul.mubr.bf16.vlgmr.msra.gmra.mrb[0].mxu1 %v1261_v62  ;;  %v3715_v62 = vld [vmem:[%s5410_s2 + $0x344] ss:$8 sps:$4 sm:$0xff]   ;;  %s3843_s2 = smov 108  }
 0x2ca   :  { %2260 = vmatpush1.bf16.msra.mxu1 %v3701_v51 }
 0x2cb   :  { %2261 = vmatprep.subr.bf16.mxu1 %v3706_v57 }
 0x2ce   :  { %2262 = vmatpush1.bf16.msra.mxu1 %v3704_v56 }
 0x2cf   :  { %2263 = vmatprep.subr.bf16.mxu1 %v3709_v29 }
 0x2d2   :  { %2264 = vmatpush1.bf16.msra.mxu1 %v3707_v43 }
 0x2d3   :  { %2265 = vmatprep.subr.bf16.mxu1 %v3712_v30 }
 0x2d6   :  { %2266 = vmatpush1.bf16.msra.mxu1 %v3710_v2 }
 0x2d7   :  { %2267 = vmatprep.subr.bf16.mxu1 %v3715_v62  ;;  %v5433_v62 = vld [vmem:[#allocation6_spill] sm:$0xff] }
 0x2da   :  { %2268 = vmatpush1.bf16.msra.mxu1 %v3713_v52 }
 0x2db   :  { %2269 = vmatprep.subr.bf16.mxu1 %v3718_v46 }
 0x2de   :  { %2270 = vmatpush1.bf16.msra.mxu1 %v3716_v45 }
 0x2df   :  { %2271 = vmatprep.subr.bf16.mxu1 %v3721_v12 }
 0x2e2   :  { %2272 = vmatpush1.bf16.msra.mxu1 %v3719_v21 }
 0x2e3   :  { %2273 = vmatprep.subr.bf16.mxu1 %v3724_v3 }
 0x2e6   :  { %2274 = vmatpush1.bf16.msra.mxu1 %v3722_v58 }
 0x2e7   :  { %2275 = vmatprep.subr.bf16.mxu1 %v3727_v54 }
 0x2ea   :  { %2276 = vmatpush1.bf16.msra.mxu1 %v3725_v27 }
 0x2eb   :  { %2277 = vmatprep.subr.bf16.mxu1 %v3733_v23 }
 0x2ee   :  { %2278 = vmatpush1.bf16.msra.mxu1 %v3731_v20 }
 0x2ef   :  { %2279 = vmatprep.subr.bf16.mxu1 %v3739_v11 }
 0x2f2   :  { %2280 = vmatpush1.bf16.msra.mxu1 %v3737_v16 }
 0x2f3   :  { %2281 = vmatprep.subr.bf16.mxu1 %v3745_v42 }
 0x2f6   :  { %2282 = vmatpush1.bf16.msra.mxu1 %v3743_v38 }
 0x2f7   :  { %2283 = vmatprep.subr.bf16.mxu1 %v3751_v14 }
 0x2fa   :  { %2284 = vmatpush1.bf16.msra.mxu1 %v3749_v60 }
 0x2fb   :  { %2285 = vmatprep.subr.bf16.mxu1 %v3757_v61 }
 0x2fe   :  { %2286 = vmatpush1.bf16.msra.mxu1 %v3755_v33 }
 0x2ff   :  { %2287 = vmatprep.subr.bf16.mxu1 %v3763_v35 }
 0x302   :  { %2288 = vmatpush1.bf16.msra.mxu1 %v3761_v44 }
 0x303   :  { %2289 = vmatprep.subr.bf16.mxu1 %v3769_v39 }
 0x306   :  { %v3522_v25 = vpop.permute.xlu1 %3521  ;;  %2290 = vmatpush1.bf16.msra.mxu1 %v3767_v59 }
 0x307   :  { %v3524_v15 = vunpack.i.h.bf16 %v3522_v25  ;;  %v3523_v13 = vunpack.i.l.bf16 %v3522_v25  ;;  %v3517_v31 = vpop.permute.xlu0 %3516 }
 0x308   :  { %v3519_v53 = vunpack.i.h.bf16 %v3517_v31  ;;  %v3518_v47 = vunpack.i.l.bf16 %v3517_v31 }
 0x30a   :  { %v1241_v36 = vsel %vm1239_vm5, %v3519_v53, %v3524_v15  ;;  %v1240_v22 = vsel %vm1239_vm5, %v3518_v47, %v3523_v13  ;;  %v1252_v5 = vsel %vm1239_vm5, %v3513_v0, %v3518_v47  ;;  %v1253_v48 = vsel %vm1239_vm5, %v3514_v8, %v3519_v53  ;;  %v3773_v53 = vld [vmem:[%s5411_s3 + $0x40] sm:$0xff]  }
 0x30b   :  { %v1256_v7 = vsel %vm1254_vm7, %v1241_v36, 1.0  ;;  %v1255_v18 = vsel %vm1254_vm7, %v1240_v22, 1.0  ;;  %v1264_v63 = vpack.c.bf16 %v1253_v48, %v1252_v5  ;;  %v3844_v15 = vmov 0.0   ;;  %v3774_v47 = vld [vmem:[%s5411_s3] sm:$0xff]   ;;  %v3775_v36 = vld [vmem:[%s5411_s3 + $0x48] sm:$0xff]   ;;  %3273 = vmatprep.subr.bf16.mxu0 %v3773_v53  ;;  %v3777_v5 = vld [vmem:[%s5411_s3 + $0x50] sm:$0xff]  }
 0x30c   :  { %v1265_v1 = vpack.c.bf16 %v1256_v7, %v1255_v18  ;;  %3321 = vmatprep.subr.bf16.mxu1 %v3844_v15  ;;  %v3776_v22 = vld [vmem:[%s5411_s3 + $0x8] sm:$0xff]   ;;  %v3778_v48 = vld [vmem:[%s5411_s3 + $0x10] sm:$0xff]   ;;  %v3779_v7 = vld [vmem:[%s5411_s3 + $0x58] sm:$0xff]  }
 0x30d   :  { %2291 = vmatprep.mubr.bf16.mxu1 %v1264_v63  ;;  %v3780_v18 = vld [vmem:[%s5411_s3 + $0x18] sm:$0xff]   ;;  %v3781_v63 = vld [vmem:[%s5411_s3 + $0x60] sm:$0xff]  }
 0x30e   :  { %2292 = vmatmul.mubr.bf16.vlgmr.msra.gmra.mrb[0].mxu1 %v1263_v10  ;;  %2335 = vmatmul.mubr.bf16.vlgmr.msra.gmra.mrb[16].mxu0 %v1265_v1  ;;  %v3782_v1 = vld [vmem:[%s5411_s3 + $0x20] sm:$0xff]  }
 0x30f   :  { %3274 = vmatpush3.bf16.msra.mxu0 %v3774_v47  ;;  %3327 = vmatprep.mubr.msk.bf16.mxu1 %vm3847_vm9, %v3844_v15 }
 0x310   :  { %3275 = vmatprep.subr.bf16.mxu0 %v3775_v36 }
 0x313   :  { %3276 = vmatpush3.bf16.msra.mxu0 %v3776_v22 }
 0x314   :  { %3277 = vmatprep.subr.bf16.mxu0 %v3777_v5 }
 0x317   :  { %3278 = vmatpush3.bf16.msra.mxu0 %v3778_v48 }
 0x318   :  { %3279 = vmatprep.subr.bf16.mxu0 %v3779_v7 }
 0x31b   :  { %3280 = vmatpush3.bf16.msra.mxu0 %v3780_v18 }
 0x31c   :  { %3281 = vmatprep.subr.bf16.mxu0 %v3781_v63 }
 0x31f   :  { %3282 = vmatpush3.bf16.msra.mxu0 %v3782_v1 }
 0x377   :  { %v2164_v41 = vpop.f32.mrb[12].mxu0 }
 0x378   :  { %v2166_v49 = vpop.f32.mrb[13].mxu0 }
 0x379   :  { %v2168_v4 = vpop.f32.mrb[14].mxu0 }
 0x37a   :  { %v2170_v40 = vpop.f32.mrb[15].mxu0 }
 0x3e1   :  { %v2293_v37 = vpop.f32.mrb[0].mxu1  ;;  %v2336_v0 = vpop.f32.mrb[16].mxu0 }
 0x3e2   :  { %v3331_v32 = vadd.f32 %v2293_v37, %v2164_v41  ;;  %v2295_v50 = vpop.f32.mrb[1].mxu1  ;;  %v2338_v34 = vpop.f32.mrb[17].mxu0  ;;  %v3783_v41 = vld [vmem:[%s5411_s3 + $0x68] sm:$0xff]   ;;  %v3787_v37 = vld [vmem:[%s5411_s3 + $0x78] sm:$0xff]  }
 0x3e3   :  { %v3333_v8 = vadd.f32 %v2295_v50, %v2166_v49  ;;  %v2297_v17 = vpop.f32.mrb[2].mxu1  ;;  %v2340_v19 = vpop.f32.mrb[18].mxu0  ;;  %v3784_v49 = vld [vmem:[%s5411_s3 + $0x28] sm:$0xff]   ;;  %3283 = vmatprep.subr.bf16.mxu0 %v3783_v41 }
 0x3e4   :  { %v3332_v6 = vadd.f32 %v3331_v32, %v2336_v0  ;;  %v3335_v28 = vadd.f32 %v2297_v17, %v2168_v4  ;;  %v2299_v24 = vpop.f32.mrb[3].mxu1  ;;  %v2342_v55 = vpop.f32.mrb[19].mxu0  ;;  %v3785_v4 = vld [vmem:[%s5411_s3 + $0x70] sm:$0xff]   ;;  %3284 = vmatpush3.bf16.msra.mxu0 %v3784_v49 }
 0x3e5   :  { %v3334_v51 = vadd.f32 %v3333_v8, %v2338_v34  ;;  %v3337_v26 = vadd.f32 %v2299_v24, %v2170_v40  ;;  %v3786_v40 = vld [vmem:[%s5411_s3 + $0x30] sm:$0xff]   ;;  %3285 = vmatprep.subr.bf16.mxu0 %v3785_v4 }
 0x3e6   :  { %v2345_v9 = vmax.f32 %v3332_v6, 0.0  ;;  %v3336_v10 = vadd.f32 %v3335_v28, %v2340_v19 }
 0x3e7   :  { %v2346_v57 = vmax.f32 %v3334_v51, 0.0  ;;  %v3338_v56 = vadd.f32 %v3337_v26, %v2342_v55  ;;  %v3845_v51 = vmov 1934713408  }
 0x3e8   :  { %v2347_v29 = vmax.f32 %v3336_v10, 0.0  ;;  %3286 = vmatpush3.bf16.msra.mxu0 %v3786_v40  ;;  %v2528_v26 = vunpack.c.l.s4 %v3845_v51 }
 0x3e9   :  { %v2353_v43 = vcombine.low %v2345_v9, %v2346_v57  ;;  %v2354_v30 = vcombine.high %v2345_v9, %v2346_v57  ;;  %v2348_v2 = vmax.f32 %v3338_v56, 0.0  ;;  %3287 = vmatprep.subr.bf16.mxu0 %v3787_v37 }
 0x3eb   :  { %v2361_v52 = vrot.slane %v2353_v43, %v5433_v62  ;;  %v2371_v46 = vcombine.low %v2347_v29, %v2348_v2  ;;  %v2372_v45 = vcombine.high %v2347_v29, %v2348_v2  ;;  %v2368_v12 = vrot.slane %v2354_v30, %v5433_v62 }
 0x3ed   :  { %v2379_v21 = vrot.slane %v2371_v46, %v5433_v62  ;;  %v2369_v3 = vcombine.high %v2361_v52, %v2361_v52  ;;  %v2386_v58 = vrot.slane %v2372_v45, %v5433_v62  ;;  %v3228_v11 = vrot.slane %v2361_v52, 9 }
 0x3ee   :  { %v2370_v16 = vcombine.high %v2368_v12, %v2368_v12  ;;  %v3230_v39 = vrot.slane %v2368_v12, 9 }
 0x3ef   :  { %v3229_v54 = vrot.slane %v2369_v3, 9  ;;  %v2387_v27 = vcombine.high %v2379_v21, %v2379_v21  ;;  %v3232_v38 = vrot.slane %v2379_v21, 9  ;;  %v2388_v14 = vcombine.high %v2386_v58, %v2386_v58 }
 0x3f0   :  { %v5222_v60 = vmax.f32 %v2361_v52, %v3228_v11  ;;  %v3231_v61 = vrot.slane %v2370_v16, 9  ;;  %v3234_v25 = vrot.slane %v2386_v58, 9  ;;  %v5235_v13 = vmax.f32 %v2368_v12, %v3230_v39  ;;  %v3788_v11 = vld [vmem:[%s5411_s3 + $0x38] sm:$0xff]  }
 0x3f1   :  { %v5216_v23 = vmax.f32 %v2369_v3, %v3229_v54  ;;  %v3233_v20 = vrot.slane %v2387_v27, 9  ;;  %v5225_v33 = vmax.f32 %v2379_v21, %v3232_v38  ;;  %v3235_v35 = vrot.slane %v2388_v14, 9  ;;  %3288 = vmatpush3.bf16.msra.mxu0 %v3788_v11 }
 0x3f2   :  { %v5228_v44 = vmax.f32 %v2370_v16, %v3231_v61  ;;  %v5238_v31 = vmax.f32 %v2386_v58, %v3234_v25  ;;  %v2529_v12 = vunpack.c.0.s8 %v2528_v26 }
 0x3f3   :  { %2439 = vrot.lane.b32.xlu0 %v5216_v23, %s3843_s2  ;;  %v5219_v42 = vmax.f32 %v2387_v27, %v3233_v20  ;;  %v5231_v59 = vmax.f32 %v2388_v14, %v3235_v35 }
 0x3f5   :  { %2447 = vrot.lane.b32.xlu1 %v5219_v42, %s3843_s2 }
 0x3f7   :  { %2437 = vrot.lane.b32.xlu0 %v5222_v60, %s3843_s2 }
 0x3f9   :  { %2445 = vrot.lane.b32.xlu1 %v5225_v33, %s3843_s2 }
 0x3fb   :  { %2443 = vrot.lane.b32.xlu0 %v5228_v44, %s3843_s2 }
 0x3fd   :  { %2451 = vrot.lane.b32.xlu1 %v5231_v59, %s3843_s2 }
 0x3ff   :  { %2441 = vrot.lane.b32.xlu0 %v5235_v13, %s3843_s2 }
 0x401   :  { %2449 = vrot.lane.b32.xlu1 %v5238_v31, %s3843_s2 }
 0x465   :  { %v2440_v0 = vpop.permute.xlu0 %2439 }
 0x466   :  { %v2454_v32 = vrot.slane %v2440_v0, 2 }
 0x467   :  { %v2448_v50 = vpop.permute.xlu1 %2447 }
 0x468   :  { %v2463_v34 = vsel %vm2461_vm8, %v2440_v0, %v2454_v32  ;;  %v2458_v8 = vrot.slane %v2448_v50, 2 }
 0x469   :  { %v2479_v17 = vmax.f32 %v5216_v23, %v2463_v34  ;;  %v2438_v19 = vpop.permute.xlu0 %2437  ;;  %v3794_v34 = vld [vmem:[%s5411_s3 + $0x108] sm:$0xff]  }
 0x46a   :  { %v2467_v6 = vsel %vm2461_vm8, %v2448_v50, %v2458_v8  ;;  %v2453_v28 = vrot.slane %v2438_v19, 2 }
 0x46b   :  { %v2483_v24 = vmax.f32 %v5219_v42, %v2467_v6  ;;  %v2446_v55 = vpop.permute.xlu1 %2445  ;;  %v2496_v57 = vrot.slane %v2479_v17, 7 }
 0x46c   :  { %v2462_v9 = vsel %vm2461_vm8, %v2438_v19, %v2453_v28  ;;  %v2457_v10 = vrot.slane %v2446_v55, 2  ;;  %v3797_v19 = vld [vmem:[%s5411_s3 + $0x110] sm:$0xff]  }
 0x46d   :  { %v2478_v56 = vmax.f32 %v5222_v60, %v2462_v9  ;;  %v2444_v29 = vpop.permute.xlu0 %2443  ;;  %v2510_v2 = vrot.slane %v2483_v24, 7 }
 0x46e   :  { %v2466_v43 = vsel %vm2461_vm8, %v2446_v55, %v2457_v10  ;;  %v2456_v30 = vrot.slane %v2444_v29, 2 }
 0x46f   :  { %v2497_v52 = vsel %vm957_vm11, %v2496_v57, %v2478_v56  ;;  %v2482_v46 = vmax.f32 %v5225_v33, %v2466_v43  ;;  %v2452_v45 = vpop.permute.xlu1 %2451  ;;  %v5434_v33 = vld [vmem:[#allocation5_spill] sm:$0xff] }
 0x470   :  { %v2498_v21 = vsel %vm961_vm13, %v2496_v57, %v2497_v52  ;;  %v2465_v3 = vsel %vm2461_vm8, %v2444_v29, %v2456_v30  ;;  %v2460_v58 = vrot.slane %v2452_v45, 2  ;;  %v2532_v35 = vsub.s32 %v2529_v12, %v5434_v33  ;;  %v3792_v30 = vld [vmem:[%s5411_s3 + $0xc8] sm:$0xff]   ;;  %v3804_v33 = vld [vmem:[%s5411_s3 + $0xf0] sm:$0xff]  }
 0x471   :  { %v2499_v54 = vsel %vm965_vm15, %v2496_v57, %v2498_v21  ;;  %v2511_v27 = vsel %vm957_vm11, %v2510_v2, %v2482_v46  ;;  %v2481_v23 = vmax.f32 %v5228_v44, %v2465_v3  ;;  %v2442_v20 = vpop.permute.xlu0 %2441  ;;  %v3789_v44 = vld [vmem:[%s5411_s3 + $0xc0] sm:$0xff]   ;;  %v3798_v3 = vld [vmem:[%s5411_s3 + $0xd8] sm:$0xff]  }
 0x472   :  { %v2512_v16 = vsel %vm961_vm13, %v2510_v2, %v2511_v27  ;;  %v2469_v42 = vsel %vm2461_vm8, %v2452_v45, %v2460_v58  ;;  %v2455_v38 = vrot.slane %v2442_v20, 2  ;;  %v2500_v53 = vsel %vm969_vm1, %v2496_v57, %v2499_v54  ;;  %3295 = vmatprep.subr.bf16.mxu0 %v3789_v44  ;;  %v3796_v45 = vld [vmem:[%s5411_s3 + $0x90] sm:$0xff]   ;;  %v3806_v44 = vld [vmem:[%s5411_s3 + $0xf8] sm:$0xff]  }
 0x473   :  { %v2513_v14 = vsel %vm965_vm15, %v2510_v2, %v2512_v16  ;;  %v2485_v60 = vmax.f32 %v5231_v59, %v2469_v42  ;;  %v2450_v61 = vpop.permute.xlu1 %2449  ;;  %v2503_v36 = vrot.slane %v2481_v23, 7  ;;  %v3791_v59 = vld [vmem:[%s5411_s3 + $0x100] sm:$0xff]   ;;  %v3799_v23 = vld [vmem:[%s5411_s3 + $0x98] sm:$0xff]  }
 0x474   :  { %v2464_v39 = vsel %vm2461_vm8, %v2442_v20, %v2455_v38  ;;  %v2459_v25 = vrot.slane %v2450_v61, 2  ;;  %v2514_v47 = vsel %vm969_vm1, %v2510_v2, %v2513_v14  ;;  %3322 = vmatpush3.bf16.msra.mxu1 %v3791_v59  ;;  %v3795_v2 = vld [vmem:[%s5411_s3 + $0xd0] sm:$0xff]   ;;  %v3800_v16 = vld [vmem:[%s5411_s3 + $0xe0] sm:$0xff]  }
 0x475   :  { %v2480_v22 = vmax.f32 %v5235_v13, %v2464_v39  ;;  %v2526_v5 = vcombine.low %v2500_v53, %v2514_v47  ;;  %v2517_v7 = vrot.slane %v2485_v60, 7  ;;  %3323 = vmatprep.subr.bf16.mxu1 %v3844_v15  ;;  %v3801_v14 = vld [vmem:[%s5411_s3 + $0xa0] sm:$0xff]   ;;  %v3802_v60 = vld [vmem:[%s5411_s3 + $0xe8] sm:$0xff]   ;;  %v3807_v39 = vld [vmem:[%s5411_s3 + $0xb8] sm:$0xff]  }
 0x476   :  { %v2468_v48 = vsel %vm2461_vm8, %v2450_v61, %v2459_v25  ;;  %v3803_v61 = vld [vmem:[%s5411_s3 + $0xa8] sm:$0xff]  }
 0x477   :  { %v2504_v18 = vsel %vm957_vm11, %v2503_v36, %v2480_v22  ;;  %v2484_v63 = vmax.f32 %v5238_v31, %v2468_v48  ;;  %v2533_v1 = vrot.slane %v2526_v5, %v2532_v35 }
 0x478   :  { %v2505_v41 = vsel %vm961_vm13, %v2503_v36, %v2504_v18  ;;  %3324 = vmatpush3.bf16.msra.mxu1 %v3794_v34 }
 0x479   :  { %v2506_v13 = vsel %vm965_vm15, %v2503_v36, %v2505_v41  ;;  %v2518_v49 = vsel %vm957_vm11, %v2517_v7, %v2484_v63  ;;  %v2534_v4 = vcombine.high %v2533_v1, %v3844_v15  ;;  %3325 = vmatprep.subr.bf16.mxu1 %v3844_v15  ;;  %v2551_v9 = vrot.slane %v2533_v1, %v5433_v62  ;;  %v3236_v41 = vld [vmem:[%s5412_s4] ss:$0 sm:$0xff] }
 0x47a   :  { %v2519_v40 = vsel %vm961_vm13, %v2517_v7, %v2518_v49  ;;  %v2507_v31 = vsel %vm969_vm1, %v2503_v36, %v2506_v13  ;;  %vm2899_vm11 = vcmask 392192  }
 0x47b   :  { %v2520_v37 = vsel %vm965_vm15, %v2517_v7, %v2519_v40  ;;  %v2562_v0 = vrot.slane %v2534_v4, %v5433_v62  ;;  %v2552_v10 = vcombine.high %v2551_v9, %v2551_v9  ;;  %v2607_v43 = vpack.c.bf16 %v2551_v9, %v2551_v9 }
 0x47c   :  { %v2521_v32 = vsel %vm969_vm1, %v2517_v7, %v2520_v37  ;;  %3326 = vmatpush3.bf16.msra.mxu1 %v3797_v19 }
 0x47d   :  { %2564 = vrot.lane.b32.xlu0 %v2562_v0, %s3846_s11  ;;  %v2535_v50 = vcombine.low %v2507_v31, %v2521_v32  ;;  %v2563_v8 = vcombine.high %v2562_v0, %v2562_v0 }
 0x47f   :  { %v2542_v17 = vrot.slane %v2535_v50, %v2532_v35  ;;  %v3805_v35 = vld [vmem:[%s5411_s3 + $0xb0] sm:$0xff]  }
 0x481   :  { %2566 = vrot.lane.b32.xlu0 %v2563_v8, %s3846_s11  ;;  %v2578_v6 = vrot.slane %v2542_v17, %v5433_v62  ;;  %v2543_v28 = vcombine.high %v2542_v17, %v3844_v15  ;;  %v3790_v15 = vld [vmem:[%s5411_s3 + $0x80] sm:$0xff]  }
 0x483   :  { %v2579_v24 = vcombine.high %v2578_v6, %v2578_v6  ;;  %v2594_v55 = vrot.slane %v2543_v28, %v5433_v62  ;;  %v3793_v62 = vld [vmem:[%s5411_s3 + $0x88] sm:$0xff]   ;;  %s3849_s3 = smov [#allocation2]  }
 0x485   :  { %v3525_v51 = vpack.i.bf16 %v2579_v24, %v2578_v6  ;;  %v2595_v26 = vcombine.high %v2594_v55, %v2594_v55 }
 0x487   :  { %3526 = vrot.lane.b32.xlu1 %v3525_v51, %s3841_s14  ;;  %2598 = vrot.lane.b32.xlu0 %v2595_v26, %s3848_s9  ;;  %s3031_s14 = sshll.u32 %s3849_s3, 4  ;;  %s3032_s14 = int_to_ptr.vmem [resolvable:$true] %s3031_s14 }
 0x488   :  { %s3808_s20 = scalar_lea.vmem %s3032_s14, 32  ;;  %p3813_p1 = scmp.lt.s32.totalorder %s3032_s14, %s3032_s14 }
 0x489   :  { %p3809_p0 = scmp.ne.s32.totalorder %s3032_s14, %s3808_s20  ;;  %p3814_p2 = scmp.lt.s32.totalorder %s3808_s20, %s3808_s20 }
 0x48b   :  { %2596 = vrot.lane.b32.xlu1 %v2594_v55, %s3848_s9  ;;  %p3815_p3 = por %p3814_p2, %p3813_p1 }
 0x48d   :  { %p3816_p4 = pnand %p3815_p3, %p3809_p0 }
 0x4ef   :  { %v2565_v57 = vpop.permute.xlu0 %2564 }
 0x4f0   :  { %v2604_v56 = vsel %vm198_vm6, %v2552_v10, %v2565_v57 }
 0x4f1   :  { %v2608_v29 = vpack.c.bf16 %v2604_v56, %v2604_v56 }
 0x4f3   :  { %2935 = vmatprep.mubr.bf16.mxu0 %v2608_v29  ;;  %v2567_v52 = vpop.permute.xlu0 %2566 }
 0x4f4   :  { %2936 = vmatmul.mubr.bf16.vlgmr.msra.gmra.mrb[20].mxu0 %v2607_v43  ;;  %v2568_v25 = vsel %vm198_vm6, %v2565_v57, %v2567_v52  ;;  %vm3023_vm6 = vcmask 33792  }
 0x4f5   :  { %3296 = vmatpush3.bf16.msra.mxu0 %v3790_v15 }
 0x4f6   :  { %3297 = vmatprep.subr.bf16.mxu0 %v3792_v30 }
 0x4f9   :  { %3298 = vmatpush3.bf16.msra.mxu0 %v3793_v62  ;;  %v3527_v46 = vpop.permute.xlu1 %3526  ;;  %v2599_v54 = vpop.permute.xlu0 %2598 }
 0x4fa   :  { %v3529_v12 = vunpack.i.h.bf16 %v3527_v46  ;;  %v3528_v21 = vunpack.i.l.bf16 %v3527_v46  ;;  %3299 = vmatprep.subr.bf16.mxu0 %v3795_v2 }
 0x4fc   :  { %v2584_v58 = vsel %vm1239_vm5, %v3528_v21, %v3529_v12  ;;  %v2605_v53 = vsel %vm1239_vm5, %v2568_v25, %v3528_v21 }
 0x4fd   :  { %3300 = vmatpush3.bf16.msra.mxu0 %v3796_v45  ;;  %v2597_v27 = vpop.permute.xlu1 %2596  ;;  %v2609_v47 = vpack.c.bf16 %v2605_v53, %v2605_v53 }
 0x4fe   :  { %v2601_v20 = vsel %vm2600_vm10, %v2597_v27, %v2599_v54  ;;  %v2606_v11 = vsel %vm2600_vm10, %v2584_v58, %v2597_v27  ;;  %3301 = vmatprep.subr.bf16.mxu0 %v3798_v3 }
 0x4ff   :  { %v2610_v42 = vpack.c.bf16 %v2606_v11, %v2606_v11  ;;  %v2611_v38 = vpack.c.bf16 %v2601_v20, %v2601_v20 }
 0x501   :  { %3302 = vmatpush3.bf16.msra.mxu0 %v3799_v23  ;;  %2975 = vmatprep.mubr.bf16.mxu0 %v2610_v42 }
 0x502   :  { %3328 = vmatmul.mubr.msk.bf16.vlgmr.msra.gmra.mrb[4].mxu1 %vm2899_vm11, %v2611_v38  ;;  %3303 = vmatprep.subr.bf16.mxu0 %v3800_v16 }
 0x505   :  { %3304 = vmatpush3.bf16.msra.mxu0 %v3801_v14 }
 0x506   :  { %3305 = vmatprep.subr.bf16.mxu0 %v3802_v60 }
 0x509   :  { %3306 = vmatpush3.bf16.msra.mxu0 %v3803_v61 }
 0x50a   :  { %3307 = vmatprep.subr.bf16.mxu0 %v3804_v33 }
 0x50d   :  { %3308 = vmatpush3.bf16.msra.mxu0 %v3805_v35 }
 0x50e   :  { %3309 = vmatprep.subr.bf16.mxu0 %v3806_v44 }
 0x511   :  { %3310 = vmatpush3.bf16.msra.mxu0 %v3807_v39 }
 0x514   :  { %2976 = vmatmul.mubr.bf16.vlgmr.msra.gmra.mrb[24].mxu0 %v2609_v47 }
 0x5c7   :  { %v3289_v36 = vpop.f32.mrb[20].mxu0 }
 0x5c8   :  { %v3290_v22 = vpop.f32.mrb[21].mxu0 }
 0x5c9   :  { %v3291_v5 = vadd.f32 %v3290_v22, %v3289_v36  ;;  %v3292_v59 = vpop.f32.mrb[22].mxu0 }
 0x5ca   :  { %v3293_v48 = vpop.f32.mrb[23].mxu0 }
 0x5cb   :  { %v2938_v4 = vadd.f32 %v3291_v5, %v3236_v41 }
 0x5d5   :  { %v3017_v7 = vpop.f32.mrb[4].mxu1 }
 0x5d6   :  { %v3329_v18 = vpop.f32.mrb[5].mxu1 }
 0x5d7   :  { %v3020_v63 = vpop.f32.mrb[6].mxu1 }
 0x5d8   :  { %v3330_v1 = vpop.f32.mrb[7].mxu1 }
 0x5e7   :  { %v3311_v13 = vpop.f32.mrb[24].mxu0 }
 0x5e8   :  { %v3312_v49 = vpop.f32.mrb[25].mxu0 }
 0x5e9   :  { %v3313_v40 = vadd.f32 %v3312_v49, %v3311_v13  ;;  %v3314_v37 = vpop.f32.mrb[26].mxu0 }
 0x5ea   :  { %v3315_v0 = vpop.f32.mrb[27].mxu0 }
 0x5eb   :  { %v2978_v31 = vadd.f32 %v3313_v40, %v2938_v4 }
 0x5ed   :  { %v3018_v32 = vadd.f32 %v3017_v7, %v2978_v31 }
 0x5ef   :  { %3024 = vst.msk [vmem:[#allocation2] sm:$0x3] %vm3023_vm6, %v3018_v32 }
 0x5f0   :  { %3819 = shalt.err (!%p3816_p4)
}
 0x5f1   :  { %s3820_s22 = scalar_lea.hbm %s5413_s5, 32 }
 0x5f2   :  { %p3821_p5 = scmp.ne.s32.totalorder %s5413_s5, %s3820_s22  ;;  %p3824_p6 = scmp.lt.u32.totalorder %s3820_s22, %s5413_s5 }
 0x5f4   :  { %p3826_p7 = pnand %p3824_p6, %p3821_p5 }
 0x5f6   :  { %3829 = shalt.err (!%p3826_p7)
}
 0x5f7   :  { %3034 = dma.vmem_to_hbm [thread:$0]  %s3032_s14, 32, %s5413_s5, [#allocation3]  }
 0x5f8   :  { %3830 = dma.done.wait [#allocation3], 32  }
 0x5f9   :  { %3831 = vsyncadd [#allocation3], 4294967264 }
 0x5fa   :  { %3038 = vsyncpa [#allocation3], 1 }

</bundles_post_ra>
